<compile_context>
chip_gen: v6e
topology: v6e:2x2x1
jax: 0.10.0
libtpu: 0.0.40
codegen_flags: <defaults>
</compile_context>

<pallas_src>
import functools

import jax
import jax.numpy as jnp
from jax.experimental import pallas as pl
from jax.experimental.pallas import tpu as pltpu


# ---------------------------------------------------------------------------
# Fused kernel (single invocation, whole batch).
#   x_ref : (Cpad, N*RPF)  zero-padded input; image n occupies lanes
#                          [n*RPF, (n+1)*RPF); real pixel (h, w) sits at lane
#                          offset (h+1)*Wp + (w+1) inside its slot.
#   w1_ref: (Cmid, 9*Cpad)          conv1 taps stacked along K (dh, dw, cin)
#   w2_ref: (Cmid, 9*Cmid + Cpad)   conv2 taps + 1x1 shortcut stacked along K
#   b_ref : (Cmid, 2)               col 0 = b1, col 1 = b2 + b3
#   o_ref : (Cmid, N*RPF)           output on the padded/flattened lane grid
# ---------------------------------------------------------------------------
def _residual_fused_kernel(x_ref, w1_ref, w2_ref, b_ref, o_ref, *,
                           H, W, N, slope):
    Wp = W + 2
    R = H * Wp                 # flattened output positions per image
    RPF = (H + 3) * Wp         # flattened padded positions per image
    TOT = N * RPF

    x = x_ref[...]             # (Cpad, TOT)

    def shift(v, s):
        # out[:, p] = v[:, (p + s) % TOT] — lane roll on the XLU slot.  The
        # wrap-around only ever lands in garbage lanes (r >= R), discarded.
        return v if s == 0 else pltpu.roll(v, TOT - s, axis=1)

    taps = [dh * Wp + dw for dh in range(3) for dw in range(3)]

    # ---- conv1 (3x3, pad 1): all 9 taps fused into ONE matmul, K = 9*Cpad --
    stacked1 = jnp.concatenate([shift(x, s) for s in taps], axis=0)
    acc1 = jnp.dot(w1_ref[...], stacked1, preferred_element_type=jnp.float32)
    acc1 = acc1 + b_ref[:, 0:1]                       # bias once, post-matmul
    y1 = jnp.where(acc1 > 0, acc1, slope * acc1)      # leaky_relu(0.1)

    # y1 is only valid where r < R and (r % Wp) < W (r = lane index inside the
    # image slot); everything else must read back as conv2's zero padding.
    # Zero with a lane mask, then one roll moves real pixel (h, w) to padded
    # lane (h+1)*Wp + (w+1).  No VMEM scratch round trip.
    r = jax.lax.broadcasted_iota(jnp.int32, y1.shape, 1) % RPF
    keep = (r < R) & ((r % Wp) < W)
    y1p = pltpu.roll(jnp.where(keep, y1, 0.0), Wp + 1, axis=1)

    # ---- conv2 (3x3, pad 1) + 1x1 shortcut: ONE matmul, K = 9*Cmid + Cpad --
    stacked2 = jnp.concatenate(
        [shift(y1p, s) for s in taps] + [shift(x, Wp + 1)], axis=0)
    acc2 = jnp.dot(w2_ref[...], stacked2, preferred_element_type=jnp.float32)
    acc2 = acc2 + b_ref[:, 1:2]                       # b2 + b3, once
    o_ref[...] = jnp.where(acc2 > 0, acc2, slope * acc2).astype(o_ref.dtype)


# ---------------------------------------------------------------------------
# JAX wrapper: layout plumbing only (padding + flattening + weight re-layout).
# ---------------------------------------------------------------------------
def _conv3x3_weight(w_oihw, cpad):
    # PyTorch OIHW (Cout, Cin, 3, 3) -> (Cout, 9*cpad); column t*cpad + ci is
    # tap t = dh*3 + dw, input channel ci (channels zero-padded to cpad).
    cout, cin, kh, kw = w_oihw.shape
    w = jnp.transpose(w_oihw, (0, 2, 3, 1))           # (Cout, kh, kw, Cin)
    w = jnp.pad(w, ((0, 0), (0, 0), (0, 0), (0, cpad - cin)))
    return w.reshape(cout, kh * kw * cpad)


def residual_forward(x_nchw, params, strides=1):
    """Forward of the PyTorch `Residual` module (leaky_relu slope 0.1)."""
    if strides != 1:
        # TODO(synk): stride>1 would need strided lane gathers for the taps;
        # only the module-default stride=1 configuration is implemented.
        raise NotImplementedError("fused Residual kernel supports strides=1")

    w1, b1, w2, b2, w3, b3 = params
    N, Cin, H, W = x_nchw.shape
    Cmid = w1.shape[0]
    Wp = W + 2
    R = H * Wp
    RPF = (H + 3) * Wp          # 1 top + 2 bottom pad rows for flat tap shifts
    TOT = N * RPF
    Cpad = -(-Cin // 8) * 8     # sublane-aligned channel count (f32 tile = 8)

    # NCHW is already the natural layout for channel-on-sublane: pad channels
    # to Cpad, H by (1, 2), W by (1, 1); flatten padded H, W and batch onto
    # the lane axis.  (No NHWC transposes.)
    xp = jnp.pad(x_nchw.astype(jnp.float32),
                 ((0, 0), (0, Cpad - Cin), (1, 2), (1, 1)))
    x_in = jnp.transpose(xp.reshape(N, Cpad, RPF), (1, 0, 2)).reshape(Cpad, TOT)

    w1cat = _conv3x3_weight(w1, Cpad)                      # (Cmid, 9*Cpad)
    w2cat = jnp.concatenate(                               # (Cmid, 9*Cmid+Cpad)
        [_conv3x3_weight(w2, Cmid),
         jnp.pad(w3.reshape(Cmid, Cin), ((0, 0), (0, Cpad - Cin)))], axis=1)
    bias = jnp.stack([b1, b2 + b3], axis=1).astype(jnp.float32)   # (Cmid, 2)

    kernel = functools.partial(_residual_fused_kernel,
                               H=H, W=W, N=N, slope=0.1)

    # Whole (tiny) problem in ONE grid step: every operand is a full VMEM
    # block (~100 KiB total), so there is no per-step pipeline overhead.
    # TODO(synk): for large N, chunk the batch over a grid axis marked
    # pltpu.CORE_PARALLEL so v7x's two TensorCores split the work.
    out_flat = pl.pallas_call(
        kernel,
        out_shape=jax.ShapeDtypeStruct((Cmid, TOT), jnp.float32),
        grid=(1,),
        in_specs=[
            pl.BlockSpec((Cpad, TOT), lambda i: (0, 0)),
            pl.BlockSpec((Cmid, 9 * Cpad), lambda i: (0, 0)),
            pl.BlockSpec((Cmid, 9 * Cmid + Cpad), lambda i: (0, 0)),
            pl.BlockSpec((Cmid, 2), lambda i: (0, 0)),
        ],
        out_specs=pl.BlockSpec((Cmid, TOT), lambda i: (0, 0)),
        compiler_params=pltpu.CompilerParams(
            dimension_semantics=("arbitrary",)),
    )(x_in, w1cat, w2cat, bias)

    # Slice out the valid lanes: per image keep r < R, per row keep w < W.
    out = out_flat.reshape(Cmid, N, RPF)[:, :, :R]
    out = out.reshape(Cmid, N, H, Wp)[:, :, :, :W]
    return jnp.transpose(out, (1, 0, 2, 3)).astype(x_nchw.dtype)


# ---------------------------------------------------------------------------
# Pure-JAX reference (numerical verification)
# ---------------------------------------------------------------------------
def _ref_conv(x_nhwc, w_oihw, b, stride, pad):
    w_hwio = jnp.transpose(w_oihw, (2, 3, 1, 0))
    y = jax.lax.conv_general_dilated(
        x_nhwc, w_hwio, (stride, stride), [(pad, pad), (pad, pad)],
        dimension_numbers=("NHWC", "HWIO", "NHWC"),
        precision=jax.lax.Precision.HIGHEST)
    return y + b


def _ref_forward(x_nchw, params, strides=1):
    w1, b1, w2, b2, w3, b3 = params
    leaky = lambda v: jnp.where(v > 0, v, 0.1 * v)
    x = jnp.transpose(x_nchw, (0, 2, 3, 1))
    y = leaky(_ref_conv(x, w1, b1, strides, 1))
    y = _ref_conv(y, w2, b2, 1, 1)
    xs = _ref_conv(x, w3, b3, strides, 0)
    out = leaky(y + xs)
    return jnp.transpose(out, (0, 3, 1, 2))


# ---------------------------------------------------------------------------
if __name__ == "__main__":
    N, Cin, H, W = 2, 4, 16, 16
    Cmid = 8
    strides = 1

    key = jax.random.PRNGKey(0)
    ks = jax.random.split(key, 7)
    scale = 0.1
    params = (
        scale * jax.random.normal(ks[0], (Cmid, Cin, 3, 3), jnp.float32),   # conv1.w
        scale * jax.random.normal(ks[1], (Cmid,), jnp.float32),             # conv1.b
        scale * jax.random.normal(ks[2], (Cmid, Cmid, 3, 3), jnp.float32),  # conv2.w
        scale * jax.random.normal(ks[3], (Cmid,), jnp.float32),             # conv2.b
        scale * jax.random.normal(ks[4], (Cmid, Cin, 1, 1), jnp.float32),   # conv3.w
        scale * jax.random.normal(ks[5], (Cmid,), jnp.float32),             # conv3.b
    )
    x = jax.random.normal(ks[6], (N, Cin, H, W), jnp.float32)

    out = jax.block_until_ready(residual_forward(x, params, strides))
    ref = jax.block_until_ready(_ref_forward(x, params, strides))

    assert out.shape == (N, Cmid, H, W), out.shape
    max_err = float(jnp.max(jnp.abs(out - ref)))
    # The kernel uses the MXU's default f32 matmul passes while the reference
    # uses Precision.HIGHEST; leave slack for that (structural bugs would show
    # up as O(0.1 - 1) errors, far above this bound).
    assert max_err < 3e-2, max_err
    print("KERNEL_OK")
</pallas_src>

<mosaic_0001>
module attributes {stable_mosaic.version = 11 : i64} {
  func.func @_residual_fused_kernel(%arg0: i32, %arg1: memref<8x684xf32, #tpu.memory_space<vmem>>, %arg2: memref<8x72xf32, #tpu.memory_space<vmem>>, %arg3: memref<8x80xf32, #tpu.memory_space<vmem>>, %arg4: memref<8x2xf32, #tpu.memory_space<vmem>>, %arg5: memref<8x684xf32, #tpu.memory_space<vmem>>) attributes {dimension_semantics = [#tpu.dimension_semantics<arbitrary>], iteration_bounds = array<i64: 1>, scalar_prefetch = 0 : i64, scratch_operands = 0 : i64, tpu.core_type = #tpu.core_type<tc>, window_params = [{pipeline_mode = #tpu.pipeline_mode<synchronous>, transform_indices = @transform_0, window_bounds = array<i64: 8, 684>}, {pipeline_mode = #tpu.pipeline_mode<synchronous>, transform_indices = @transform_1, window_bounds = array<i64: 8, 72>}, {pipeline_mode = #tpu.pipeline_mode<synchronous>, transform_indices = @transform_2, window_bounds = array<i64: 8, 80>}, {pipeline_mode = #tpu.pipeline_mode<synchronous>, transform_indices = @transform_3, window_bounds = array<i64: 8, 2>}, {pipeline_mode = #tpu.pipeline_mode<synchronous>, transform_indices = @transform_4, window_bounds = array<i64: 8, 684>}]} {
    %c0 = arith.constant 0 : index
    %c0_0 = arith.constant 0 : index
    %0 = vector.load %arg1[%c0, %c0_0] : memref<8x684xf32, #tpu.memory_space<vmem>>, vector<8x684xf32>
    %c683_i32 = arith.constant 683 : i32
    %1 = tpu.dynamic_rotate %0 by %c683_i32 dim 1 : vector<8x684xf32>, i32 -> vector<8x684xf32>
    %c682_i32 = arith.constant 682 : i32
    %2 = tpu.dynamic_rotate %0 by %c682_i32 dim 1 : vector<8x684xf32>, i32 -> vector<8x684xf32>
    %c666_i32 = arith.constant 666 : i32
    %3 = tpu.dynamic_rotate %0 by %c666_i32 dim 1 : vector<8x684xf32>, i32 -> vector<8x684xf32>
    %c665_i32 = arith.constant 665 : i32
    %4 = tpu.dynamic_rotate %0 by %c665_i32 dim 1 : vector<8x684xf32>, i32 -> vector<8x684xf32>
    %c664_i32 = arith.constant 664 : i32
    %5 = tpu.dynamic_rotate %0 by %c664_i32 dim 1 : vector<8x684xf32>, i32 -> vector<8x684xf32>
    %c648_i32 = arith.constant 648 : i32
    %6 = tpu.dynamic_rotate %0 by %c648_i32 dim 1 : vector<8x684xf32>, i32 -> vector<8x684xf32>
    %c647_i32 = arith.constant 647 : i32
    %7 = tpu.dynamic_rotate %0 by %c647_i32 dim 1 : vector<8x684xf32>, i32 -> vector<8x684xf32>
    %c646_i32 = arith.constant 646 : i32
    %8 = tpu.dynamic_rotate %0 by %c646_i32 dim 1 : vector<8x684xf32>, i32 -> vector<8x684xf32>
    %9 = tpu.concatenate %0, %1, %2, %3, %4, %5, %6, %7, %8 in 0 : vector<8x684xf32>, vector<8x684xf32>, vector<8x684xf32>, vector<8x684xf32>, vector<8x684xf32>, vector<8x684xf32>, vector<8x684xf32>, vector<8x684xf32>, vector<8x684xf32> -> vector<72x684xf32>
    %c0_1 = arith.constant 0 : index
    %c0_2 = arith.constant 0 : index
    %10 = vector.load %arg2[%c0_1, %c0_2] : memref<8x72xf32, #tpu.memory_space<vmem>>, vector<8x72xf32>
    %cst = arith.constant dense<0.000000e+00> : vector<8x684xf32>
    %11 = tpu.matmul %10, %9, %cst {dimension_numbers = #tpu.dot_dimension_numbers<[1], [0], [0], [1], [0, 0, 1, 1], [], []>} : vector<8x72xf32>, vector<72x684xf32>, vector<8x684xf32> -> vector<8x684xf32>
    %c0_3 = arith.constant 0 : index
    %c0_4 = arith.constant 0 : index
    %12 = vector.load %arg4[%c0_3, %c0_4] : memref<8x2xf32, #tpu.memory_space<vmem>>, vector<8x1xf32>
    %13 = vector.broadcast %12 : vector<8x1xf32> to vector<8x684xf32>
    %14 = arith.addf %11, %13 : vector<8x684xf32>
    %cst_5 = arith.constant 0.000000e+00 : f32
    %15 = vector.broadcast %cst_5 : f32 to vector<8x684xf32>
    %16 = arith.cmpf ogt, %14, %15 : vector<8x684xf32>
    %cst_6 = arith.constant 1.000000e-01 : f32
    %17 = vector.broadcast %cst_6 : f32 to vector<8x684xf32>
    %18 = arith.mulf %17, %14 : vector<8x684xf32>
    %19 = arith.select %16, %14, %18 : vector<8x684xi1>, vector<8x684xf32>
    %20 = tpu.iota {dimensions = array<i32: 1>} : vector<8x684xi32>
    %c342_i32 = arith.constant 342 : i32
    %c0_i32 = arith.constant 0 : i32
    %21 = arith.cmpi eq, %c342_i32, %c0_i32 : i32
    %c1_i32 = arith.constant 1 : i32
    %22 = arith.select %21, %c1_i32, %c342_i32 : i32
    %23 = vector.broadcast %22 : i32 to vector<8x684xi32>
    %24 = arith.remsi %20, %23 : vector<8x684xi32>
    %c0_i32_7 = arith.constant 0 : i32
    %25 = vector.broadcast %c0_i32_7 : i32 to vector<8x684xi32>
    %26 = arith.cmpi ne, %24, %25 : vector<8x684xi32>
    %c0_i32_8 = arith.constant 0 : i32
    %27 = vector.broadcast %c0_i32_8 : i32 to vector<8x684xi32>
    %28 = arith.cmpi slt, %24, %27 : vector<8x684xi32>
    %c0_i32_9 = arith.constant 0 : i32
    %29 = arith.cmpi slt, %22, %c0_i32_9 : i32
    %30 = vector.broadcast %29 : i1 to vector<8x684xi1>
    %31 = vector.broadcast %30 : vector<8x684xi1> to vector<8x684xi1>
    %32 = arith.xori %28, %31 : vector<8x684xi1>
    %33 = arith.andi %32, %26 : vector<8x684xi1>
    %34 = vector.broadcast %22 : i32 to vector<8x684xi32>
    %35 = arith.addi %24, %34 : vector<8x684xi32>
    %36 = arith.select %33, %35, %24 : vector<8x684xi1>, vector<8x684xi32>
    %c288_i32 = arith.constant 288 : i32
    %37 = vector.broadcast %c288_i32 : i32 to vector<8x684xi32>
    %38 = arith.cmpi slt, %36, %37 : vector<8x684xi32>
    %c18_i32 = arith.constant 18 : i32
    %c0_i32_10 = arith.constant 0 : i32
    %39 = arith.cmpi eq, %c18_i32, %c0_i32_10 : i32
    %c1_i32_11 = arith.constant 1 : i32
    %40 = arith.select %39, %c1_i32_11, %c18_i32 : i32
    %41 = vector.broadcast %40 : i32 to vector<8x684xi32>
    %42 = arith.remsi %36, %41 : vector<8x684xi32>
    %c0_i32_12 = arith.constant 0 : i32
    %43 = vector.broadcast %c0_i32_12 : i32 to vector<8x684xi32>
    %44 = arith.cmpi ne, %42, %43 : vector<8x684xi32>
    %c0_i32_13 = arith.constant 0 : i32
    %45 = vector.broadcast %c0_i32_13 : i32 to vector<8x684xi32>
    %46 = arith.cmpi slt, %42, %45 : vector<8x684xi32>
    %c0_i32_14 = arith.constant 0 : i32
    %47 = arith.cmpi slt, %40, %c0_i32_14 : i32
    %48 = vector.broadcast %47 : i1 to vector<8x684xi1>
    %49 = vector.broadcast %48 : vector<8x684xi1> to vector<8x684xi1>
    %50 = arith.xori %46, %49 : vector<8x684xi1>
    %51 = arith.andi %50, %44 : vector<8x684xi1>
    %52 = vector.broadcast %40 : i32 to vector<8x684xi32>
    %53 = arith.addi %42, %52 : vector<8x684xi32>
    %54 = arith.select %51, %53, %42 : vector<8x684xi1>, vector<8x684xi32>
    %c16_i32 = arith.constant 16 : i32
    %55 = vector.broadcast %c16_i32 : i32 to vector<8x684xi32>
    %56 = arith.cmpi slt, %54, %55 : vector<8x684xi32>
    %57 = arith.andi %38, %56 : vector<8x684xi1>
    %cst_15 = arith.constant 0.000000e+00 : f32
    %58 = vector.broadcast %cst_15 : f32 to vector<8x684xf32>
    %59 = arith.select %57, %19, %58 : vector<8x684xi1>, vector<8x684xf32>
    %c19_i32 = arith.constant 19 : i32
    %60 = tpu.dynamic_rotate %59 by %c19_i32 dim 1 : vector<8x684xf32>, i32 -> vector<8x684xf32>
    %c683_i32_16 = arith.constant 683 : i32
    %61 = tpu.dynamic_rotate %60 by %c683_i32_16 dim 1 : vector<8x684xf32>, i32 -> vector<8x684xf32>
    %c682_i32_17 = arith.constant 682 : i32
    %62 = tpu.dynamic_rotate %60 by %c682_i32_17 dim 1 : vector<8x684xf32>, i32 -> vector<8x684xf32>
    %c666_i32_18 = arith.constant 666 : i32
    %63 = tpu.dynamic_rotate %60 by %c666_i32_18 dim 1 : vector<8x684xf32>, i32 -> vector<8x684xf32>
    %c665_i32_19 = arith.constant 665 : i32
    %64 = tpu.dynamic_rotate %60 by %c665_i32_19 dim 1 : vector<8x684xf32>, i32 -> vector<8x684xf32>
    %c664_i32_20 = arith.constant 664 : i32
    %65 = tpu.dynamic_rotate %60 by %c664_i32_20 dim 1 : vector<8x684xf32>, i32 -> vector<8x684xf32>
    %c648_i32_21 = arith.constant 648 : i32
    %66 = tpu.dynamic_rotate %60 by %c648_i32_21 dim 1 : vector<8x684xf32>, i32 -> vector<8x684xf32>
    %c647_i32_22 = arith.constant 647 : i32
    %67 = tpu.dynamic_rotate %60 by %c647_i32_22 dim 1 : vector<8x684xf32>, i32 -> vector<8x684xf32>
    %c646_i32_23 = arith.constant 646 : i32
    %68 = tpu.dynamic_rotate %60 by %c646_i32_23 dim 1 : vector<8x684xf32>, i32 -> vector<8x684xf32>
    %c665_i32_24 = arith.constant 665 : i32
    %69 = tpu.dynamic_rotate %0 by %c665_i32_24 dim 1 : vector<8x684xf32>, i32 -> vector<8x684xf32>
    %70 = tpu.concatenate %60, %61, %62, %63, %64, %65, %66, %67, %68, %69 in 0 : vector<8x684xf32>, vector<8x684xf32>, vector<8x684xf32>, vector<8x684xf32>, vector<8x684xf32>, vector<8x684xf32>, vector<8x684xf32>, vector<8x684xf32>, vector<8x684xf32>, vector<8x684xf32> -> vector<80x684xf32>
    %c0_25 = arith.constant 0 : index
    %c0_26 = arith.constant 0 : index
    %71 = vector.load %arg3[%c0_25, %c0_26] : memref<8x80xf32, #tpu.memory_space<vmem>>, vector<8x80xf32>
    %cst_27 = arith.constant dense<0.000000e+00> : vector<8x684xf32>
    %72 = tpu.matmul %71, %70, %cst_27 {dimension_numbers = #tpu.dot_dimension_numbers<[1], [0], [0], [1], [0, 0, 1, 1], [], []>} : vector<8x80xf32>, vector<80x684xf32>, vector<8x684xf32> -> vector<8x684xf32>
    %c0_28 = arith.constant 0 : index
    %c1 = arith.constant 1 : index
    %73 = vector.load %arg4[%c0_28, %c1] : memref<8x2xf32, #tpu.memory_space<vmem>>, vector<8x1xf32>
    %74 = vector.broadcast %73 : vector<8x1xf32> to vector<8x684xf32>
    %75 = arith.addf %72, %74 : vector<8x684xf32>
    %cst_29 = arith.constant 0.000000e+00 : f32
    %76 = vector.broadcast %cst_29 : f32 to vector<8x684xf32>
    %77 = arith.cmpf ogt, %75, %76 : vector<8x684xf32>
    %cst_30 = arith.constant 1.000000e-01 : f32
    %78 = vector.broadcast %cst_30 : f32 to vector<8x684xf32>
    %79 = arith.mulf %78, %75 : vector<8x684xf32>
    %80 = arith.select %77, %75, %79 : vector<8x684xi1>, vector<8x684xf32>
    %c0_31 = arith.constant 0 : index
    %c0_32 = arith.constant 0 : index
    %81 = vector.load %arg5[%c0_31, %c0_32] : memref<8x684xf32, #tpu.memory_space<vmem>>, vector<8x684xf32>
    tpu.vector_store %arg5[%c0_31, %c0_32], %80 {strides = array<i32>} : memref<8x684xf32, #tpu.memory_space<vmem>>, vector<8x684xf32>,
    return
  }
  func.func @transform_0(%arg0: i32) -> (i32, i32) {
    %c0_i32 = arith.constant 0 : i32
    %c0_i32_0 = arith.constant 0 : i32
    %c0_i32_1 = arith.constant 0 : i32
    return %c0_i32, %c0_i32_0 : i32, i32
  }
  func.func @transform_1(%arg0: i32) -> (i32, i32) {
    %c0_i32 = arith.constant 0 : i32
    %c0_i32_0 = arith.constant 0 : i32
    %c0_i32_1 = arith.constant 0 : i32
    return %c0_i32, %c0_i32_0 : i32, i32
  }
  func.func @transform_2(%arg0: i32) -> (i32, i32) {
    %c0_i32 = arith.constant 0 : i32
    %c0_i32_0 = arith.constant 0 : i32
    %c0_i32_1 = arith.constant 0 : i32
    return %c0_i32, %c0_i32_0 : i32, i32
  }
  func.func @transform_3(%arg0: i32) -> (i32, i32) {
    %c0_i32 = arith.constant 0 : i32
    %c0_i32_0 = arith.constant 0 : i32
    %c0_i32_1 = arith.constant 0 : i32
    return %c0_i32, %c0_i32_0 : i32, i32
  }
  func.func @transform_4(%arg0: i32) -> (i32, i32) {
    %c0_i32 = arith.constant 0 : i32
    %c0_i32_0 = arith.constant 0 : i32
    %c0_i32_1 = arith.constant 0 : i32
    return %c0_i32, %c0_i32_0 : i32, i32
  }
}

</mosaic_0001>

<bundles_post_ra>
// kernel: tpu_custom_call.1
= control target key start
LH: loop header
LB: loop body
LE: loop exit
PB: predicated region body
PF: predicated region fallthrough
CT: control target
= control target key end

     0   :  { %9 = vsyncpa [#allocation3], 0  ;;  %s2365_s0 = inlined_call_operand.hbm [shape: f32[8,684], index: 0, kind: input, shape index: {}]   ;;  %s2366_s1 = inlined_call_operand.vmem [shape: f32[8,72], index: 1, kind: input, shape index: {}]   ;;  %s2367_s2 = inlined_call_operand.hbm [shape: f32[8,80], index: 2, kind: input, shape index: {}]   ;;  %s2368_s3 = inlined_call_operand.vmem [shape: f32[8,2], index: 3, kind: input, shape index: {}]   ;;  %s2369_s4 = inlined_call_operand.hbm [shape: f32[8,684], index: 4, kind: output, shape index: {}]  }
   0x1   :  { %10 = vsyncpa [#allocation6], 0 }
   0x2   :  { %11 = vsyncpa [#allocation4], 0  ;;  %s1546_s15 = smov [#allocation2]   ;;  %s1547_s17 = smov [#allocation5]  }
   0x3   :  { %s18_s16 = sshll.u32 %s1546_s15, 4  ;;  %s30_s18 = sshll.u32 %s1547_s17, 4  ;;  %s19_s16 = int_to_ptr.vmem [resolvable:$true] %s18_s16  ;;  %s31_s18 = int_to_ptr.vmem [resolvable:$true] %s30_s18 }
   0x4   :  { %s1488_s19 = scalar_lea.vmem %s19_s16, 768  ;;  %p1493_p1 = scmp.lt.s32.totalorder %s19_s16, %s19_s16 }
   0x5   :  { %p1489_p0 = scmp.ne.s32.totalorder %s19_s16, %s1488_s19  ;;  %p1494_p2 = scmp.lt.s32.totalorder %s1488_s19, %s1488_s19 }
   0x7   :  { %p1495_p3 = por %p1494_p2, %p1493_p1 }
   0x9   :  { %p1496_p4 = pnand %p1495_p3, %p1489_p0 }
   0xb   :  { %1499 = shalt.err (!%p1496_p4)
}
   0xc   :  { %21 = dma.hbm_to_vmem [thread:$0]  %s2365_s0, 768, %s19_s16, [#allocation3]  }
   0xd   :  { %s1508_s22 = scalar_lea.vmem %s31_s18, 128  ;;  %p1513_p6 = scmp.lt.s32.totalorder %s31_s18, %s31_s18 }
   0xe   :  { %p1509_p5 = scmp.ne.s32.totalorder %s31_s18, %s1508_s22  ;;  %p1514_p7 = scmp.lt.s32.totalorder %s1508_s22, %s1508_s22 }
  0x10   :  { %p1515_p8 = por %p1514_p7, %p1513_p6 }
  0x12   :  { %p1516_p9 = pnand %p1515_p8, %p1509_p5 }
  0x14   :  { %1519 = shalt.err (!%p1516_p9)
}
  0x15   :  { %33 = dma.hbm_to_vmem [thread:$0]  %s2367_s2, 128, %s31_s18, [#allocation6]  }
  0x16   :  { %1540 = dma.done.wait [#allocation3], 768  }
  0x17   :  { %1541 = vsyncadd [#allocation3], 4294966528 }
  0x18   :  { %1542 = dma.done.wait [#allocation6], 128  }
  0x19   :  { %1543 = vsyncadd [#allocation6], 4294967168  ;;  %v1601_v0 = vld [vmem:[#allocation2 + $0x10] sm:$0xff]  ;;  %v1603_v1 = vld [vmem:[#allocation2] sm:$0xff]  ;;  %s1548_s0 = smov 90   ;;  %s1549_s25 = smov 44  }
  0x1a   :  { %230 = vrot.lane.b32.xlu1 %v1601_v0, %s1548_s0  ;;  %49 = vrot.lane.b32.xlu0 %v1603_v1, %s1549_s25  ;;  %v1609_v2 = vld [vmem:[#allocation2 + $0x8] sm:$0xff]  ;;  %s1550_s2 = smov 91   ;;  %s1551_s26 = smov 92   ;;  %v1556_v3 = vmov 0.0   ;;  %v1657_v4 = vld [vmem:[#allocation2 + $0x18] sm:$0xff]  ;;  %v1663_v5 = vld [vmem:[#allocation2 + $0x20] sm:$0xff] }
  0x1b   :  { %s1552_s27 = smov 108   ;;  %s1553_s28 = smov 109   ;;  %325 = vmatprep.mubr.f32.mxu0 %v1556_v3  ;;  %396 = vmatprep.mubr.f32.mxu1 %v1556_v3  ;;  %v1558_v6 = vmov 0   ;;  %v1696_v7 = vld [vmem:[#allocation2 + $0x28] sm:$0xff]  ;;  %vm48_vm0 = vcmask 1047904   ;;  %vm238_vm1 = vcmask 736256  }
  0x1c   :  { %s1554_s29 = smov 110   ;;  %s1555_s30 = smov 126   ;;  %1476 = vset.pattern.permute.xlu1 %v1558_v6  ;;  %vm214_vm2 = vcmask 744448   ;;  %vm190_vm3 = vcmask 752640   ;;  %v251_v21 = vld [vmem:[%s2368_s3] sm:$0xff]  ;;  %vm166_vm4 = vcmask 883712  }
  0x1d   :  { %s1557_s5 = smov 127   ;;  %vm142_vm5 = vcmask 891904   ;;  %vm118_vm6 = vcmask 900096   ;;  %vm94_vm7 = vcmask 1031168   ;;  %vm70_vm8 = vcmask 1039360   ;;  %v1758_v52 = vld [vmem:[%s2366_s1] sm:$0xff] }
  0x1e   :  { %226 = vrot.lane.b32.xlu1 %v1603_v1, %s1548_s0  ;;  %228 = vrot.lane.b32.xlu0 %v1609_v2, %s1548_s0  ;;  %vm257_vm9 = vcmask 588800   ;;  %s1559_s1 = smov 6   ;;  %s1560_s10 = smov 103  }
  0x1f   :  { %s1561_s11 = smov 115   ;;  %s1562_s12 = smov 116  }
  0x20   :  { %s1563_s13 = smov 117   ;;  %s1564_s14 = smov 5  }
  0x21   :  { %s1565_s15 = smov 7   ;;  %s1566_s16 = smov 23  }
  0x22   :  { %206 = vrot.lane.b32.xlu1 %v1601_v0, %s1550_s2  ;;  %204 = vrot.lane.b32.xlu0 %v1609_v2, %s1550_s2  ;;  %s1567_s17 = smov 24  }
  0x26   :  { %180 = vrot.lane.b32.xlu1 %v1609_v2, %s1551_s26  ;;  %202 = vrot.lane.b32.xlu0 %v1603_v1, %s1550_s2 }
  0x2a   :  { %178 = vrot.lane.b32.xlu1 %v1603_v1, %s1551_s26  ;;  %182 = vrot.lane.b32.xlu0 %v1601_v0, %s1551_s26 }
  0x2e   :  { %158 = vrot.lane.b32.xlu1 %v1601_v0, %s1552_s27  ;;  %156 = vrot.lane.b32.xlu0 %v1609_v2, %s1552_s27 }
  0x32   :  { %132 = vrot.lane.b32.xlu1 %v1609_v2, %s1553_s28  ;;  %154 = vrot.lane.b32.xlu0 %v1603_v1, %s1552_s27 }
  0x36   :  { %130 = vrot.lane.b32.xlu1 %v1603_v1, %s1553_s28  ;;  %134 = vrot.lane.b32.xlu0 %v1601_v0, %s1553_s28 }
  0x3a   :  { %110 = vrot.lane.b32.xlu1 %v1601_v0, %s1554_s29  ;;  %108 = vrot.lane.b32.xlu0 %v1609_v2, %s1554_s29 }
  0x3e   :  { %84 = vrot.lane.b32.xlu1 %v1609_v2, %s1555_s30  ;;  %106 = vrot.lane.b32.xlu0 %v1603_v1, %s1554_s29 }
  0x42   :  { %82 = vrot.lane.b32.xlu1 %v1603_v1, %s1555_s30  ;;  %86 = vrot.lane.b32.xlu0 %v1601_v0, %s1555_s30 }
  0x46   :  { %62 = vrot.lane.b32.xlu1 %v1601_v0, %s1557_s5  ;;  %60 = vrot.lane.b32.xlu0 %v1609_v2, %s1557_s5 }
  0x4a   :  { %232 = vrot.lane.b32.xlu1 %v1657_v4, %s1548_s0  ;;  %58 = vrot.lane.b32.xlu0 %v1603_v1, %s1557_s5 }
  0x4e   :  { %208 = vrot.lane.b32.xlu1 %v1657_v4, %s1550_s2  ;;  %234 = vrot.lane.b32.xlu0 %v1663_v5, %s1548_s0 }
  0x52   :  { %186 = vrot.lane.b32.xlu1 %v1663_v5, %s1551_s26  ;;  %210 = vrot.lane.b32.xlu0 %v1663_v5, %s1550_s2 }
  0x56   :  { %160 = vrot.lane.b32.xlu1 %v1657_v4, %s1552_s27  ;;  %184 = vrot.lane.b32.xlu0 %v1657_v4, %s1551_s26 }
  0x5a   :  { %138 = vrot.lane.b32.xlu1 %v1663_v5, %s1553_s28  ;;  %162 = vrot.lane.b32.xlu0 %v1663_v5, %s1552_s27 }
  0x5e   :  { %112 = vrot.lane.b32.xlu1 %v1657_v4, %s1554_s29  ;;  %136 = vrot.lane.b32.xlu0 %v1657_v4, %s1553_s28 }
  0x62   :  { %90 = vrot.lane.b32.xlu1 %v1663_v5, %s1555_s30  ;;  %114 = vrot.lane.b32.xlu0 %v1663_v5, %s1554_s29 }
  0x66   :  { %64 = vrot.lane.b32.xlu1 %v1657_v4, %s1557_s5  ;;  %88 = vrot.lane.b32.xlu0 %v1657_v4, %s1555_s30 }
  0x6a   :  { %66 = vrot.lane.b32.xlu0 %v1663_v5, %s1557_s5 }
  0x8c   :  { %v1698_v8 = vpop.permute.xlu1 %230  ;;  %v50_v9 = vpop.permute.xlu0 %49 }
  0x8d   :  { %v1702_v10 = vsel %vm48_vm0, %v50_v9, %v1696_v7 }
  0x8e   :  { %212 = vrot.lane.b32.xlu0 %v1702_v10, %s1550_s2  ;;  %236 = vrot.lane.b32.xlu1 %v1702_v10, %s1548_s0 }
  0x90   :  { %v227_v11 = vpop.permute.xlu1 %226  ;;  %v229_v12 = vpop.permute.xlu0 %228 }
  0x91   :  { %v240_v13 = vsel %vm238_vm1, %v229_v12, %v1698_v8  ;;  %v239_v14 = vsel %vm238_vm1, %v227_v11, %v229_v12 }
  0x92   :  { %164 = vrot.lane.b32.xlu0 %v1702_v10, %s1552_s27  ;;  %188 = vrot.lane.b32.xlu1 %v1702_v10, %s1551_s26 }
  0x93   :  { %275 = vmatprep.subr.mxu0 %v240_v13 }
  0x94   :  { %276 = vmatpush1.msra.mxu0 %v239_v14  ;;  %v1715_v15 = vpop.permute.xlu1 %206  ;;  %v205_v16 = vpop.permute.xlu0 %204 }
  0x95   :  { %v216_v17 = vsel %vm214_vm2, %v205_v16, %v1715_v15 }
  0x96   :  { %116 = vrot.lane.b32.xlu0 %v1702_v10, %s1554_s29  ;;  %140 = vrot.lane.b32.xlu1 %v1702_v10, %s1553_s28 }
  0x97   :  { %277 = vmatprep.subr.mxu0 %v216_v17 }
  0x98   :  { %v181_v18 = vpop.permute.xlu1 %180  ;;  %v203_v19 = vpop.permute.xlu0 %202 }
  0x99   :  { %v215_v20 = vsel %vm214_vm2, %v203_v19, %v205_v16 }
  0x9a   :  { %68 = vrot.lane.b32.xlu0 %v1702_v10, %s1557_s5  ;;  %92 = vrot.lane.b32.xlu1 %v1702_v10, %s1555_s30 }
  0x9b   :  { %278 = vmatpush1.msra.mxu0 %v215_v20 }
  0x9c   :  { %v179_v22 = vpop.permute.xlu1 %178  ;;  %v1731_v23 = vpop.permute.xlu0 %182 }
  0x9d   :  { %v192_v24 = vsel %vm190_vm3, %v181_v18, %v1731_v23  ;;  %v191_v25 = vsel %vm190_vm3, %v179_v22, %v181_v18 }
  0x9e   :  { %279 = vmatprep.subr.mxu0 %v192_v24  ;;  %254 = vperm.xlu1 %1476, %v251_v21  }
  0x9f   :  { %280 = vmatpush1.msra.mxu0 %v191_v25 }
  0xa0   :  { %v1736_v26 = vpop.permute.xlu1 %158  ;;  %v157_v27 = vpop.permute.xlu0 %156 }
  0xa1   :  { %v168_v28 = vsel %vm166_vm4, %v157_v27, %v1736_v26 }
  0xa2   :  { %281 = vmatprep.subr.mxu0 %v168_v28 }
  0xa4   :  { %v133_v29 = vpop.permute.xlu1 %132  ;;  %v155_v30 = vpop.permute.xlu0 %154 }
  0xa5   :  { %v167_v31 = vsel %vm166_vm4, %v155_v30, %v157_v27 }
  0xa6   :  { %282 = vmatpush1.msra.mxu0 %v167_v31 }
  0xa8   :  { %v131_v32 = vpop.permute.xlu1 %130  ;;  %v1741_v33 = vpop.permute.xlu0 %134 }
  0xa9   :  { %v144_v34 = vsel %vm142_vm5, %v133_v29, %v1741_v33  ;;  %v143_v35 = vsel %vm142_vm5, %v131_v32, %v133_v29 }
  0xaa   :  { %283 = vmatprep.subr.mxu0 %v144_v34 }
  0xab   :  { %284 = vmatpush1.msra.mxu0 %v143_v35 }
  0xac   :  { %v1746_v36 = vpop.permute.xlu1 %110  ;;  %v109_v37 = vpop.permute.xlu0 %108 }
  0xad   :  { %v120_v38 = vsel %vm118_vm6, %v109_v37, %v1746_v36 }
  0xae   :  { %285 = vmatprep.subr.mxu0 %v120_v38 }
  0xb0   :  { %v85_v39 = vpop.permute.xlu1 %84  ;;  %v107_v40 = vpop.permute.xlu0 %106 }
  0xb1   :  { %v119_v41 = vsel %vm118_vm6, %v107_v40, %v109_v37 }
  0xb2   :  { %286 = vmatpush1.msra.mxu0 %v119_v41 }
  0xb4   :  { %v83_v42 = vpop.permute.xlu1 %82  ;;  %v87_v43 = vpop.permute.xlu0 %86 }
  0xb5   :  { %v96_v44 = vsel %vm94_vm7, %v85_v39, %v87_v43  ;;  %v95_v45 = vsel %vm94_vm7, %v83_v42, %v85_v39 }
  0xb6   :  { %287 = vmatprep.subr.mxu0 %v96_v44 }
  0xb7   :  { %288 = vmatpush1.msra.mxu0 %v95_v45  ;;  %v492_v45 = vlaneseq }
  0xb8   :  { %v63_v46 = vpop.permute.xlu1 %62  ;;  %v61_v47 = vpop.permute.xlu0 %60 }
  0xb9   :  { %v72_v48 = vsel %vm70_vm8, %v61_v47, %v63_v46 }
  0xba   :  { %289 = vmatprep.subr.mxu0 %v72_v48 }
  0xbc   :  { %v233_v49 = vpop.permute.xlu1 %232  ;;  %v59_v50 = vpop.permute.xlu0 %58 }
  0xbd   :  { %v71_v51 = vsel %vm70_vm8, %v59_v50, %v61_v47  ;;  %v241_v56 = vsel %vm238_vm1, %v1698_v8, %v233_v49 }
  0xbe   :  { %290 = vmatpush1.msra.mxu0 %v71_v51 }
  0xbf   :  { %291 = vmatprep.subr.mxu0 %v1609_v2 }
  0xc0   :  { %v209_v53 = vpop.permute.xlu1 %208  ;;  %292 = vmatpush1.msra.mxu0 %v1603_v1  ;;  %v235_v54 = vpop.permute.xlu0 %234 }
  0xc1   :  { %1416 = vmatmul.mubr.msk.f32.vlgmr.msra.gmra.mxu0 %vm257_vm9, %v1758_v52  ;;  %v242_v55 = vsel %vm238_vm1, %v233_v49, %v235_v54  ;;  %v217_v60 = vsel %vm214_vm2, %v1715_v15, %v209_v53 }
  0xc2   :  { %346 = vmatprep.subr.mxu1 %v242_v55  ;;  %467 = vmatprep.mubr.f32.mxu0 %v1556_v3 }
  0xc3   :  { %347 = vmatpush1.msra.mxu1 %v241_v56 }
  0xc4   :  { %v187_v57 = vpop.permute.xlu1 %186  ;;  %v211_v58 = vpop.permute.xlu0 %210 }
  0xc5   :  { %v218_v59 = vsel %vm214_vm2, %v209_v53, %v211_v58 }
  0xc6   :  { %348 = vmatprep.subr.mxu1 %v218_v59 }
  0xc7   :  { %349 = vmatpush1.msra.mxu1 %v217_v60 }
  0xc8   :  { %v161_v61 = vpop.permute.xlu1 %160  ;;  %v185_v62 = vpop.permute.xlu0 %184 }
  0xc9   :  { %v194_v63 = vsel %vm190_vm3, %v185_v62, %v187_v57  ;;  %v193_v9 = vsel %vm190_vm3, %v1731_v23, %v185_v62  ;;  %v169_v13 = vsel %vm166_vm4, %v1736_v26, %v161_v61 }
  0xca   :  { %350 = vmatprep.subr.mxu1 %v194_v63 }
  0xcb   :  { %351 = vmatpush1.msra.mxu1 %v193_v9 }
  0xcc   :  { %v139_v8 = vpop.permute.xlu1 %138  ;;  %v163_v11 = vpop.permute.xlu0 %162 }
  0xcd   :  { %v170_v12 = vsel %vm166_vm4, %v161_v61, %v163_v11 }
  0xce   :  { %352 = vmatprep.subr.mxu1 %v170_v12 }
  0xcf   :  { %353 = vmatpush1.msra.mxu1 %v169_v13 }
  0xd0   :  { %v113_v14 = vpop.permute.xlu1 %112  ;;  %v137_v15 = vpop.permute.xlu0 %136 }
  0xd1   :  { %v146_v16 = vsel %vm142_vm5, %v137_v15, %v139_v8  ;;  %v145_v17 = vsel %vm142_vm5, %v1741_v33, %v137_v15  ;;  %v121_v21 = vsel %vm118_vm6, %v1746_v36, %v113_v14 }
  0xd2   :  { %354 = vmatprep.subr.mxu1 %v146_v16 }
  0xd3   :  { %355 = vmatpush1.msra.mxu1 %v145_v17 }
  0xd4   :  { %v115_v18 = vpop.permute.xlu0 %114  ;;  %v91_v19 = vpop.permute.xlu1 %90 }
  0xd5   :  { %v122_v20 = vsel %vm118_vm6, %v113_v14, %v115_v18 }
  0xd6   :  { %356 = vmatprep.subr.mxu1 %v122_v20 }
  0xd7   :  { %357 = vmatpush1.msra.mxu1 %v121_v21 }
  0xd8   :  { %v89_v22 = vpop.permute.xlu0 %88  ;;  %v65_v25 = vpop.permute.xlu1 %64 }
  0xd9   :  { %v98_v23 = vsel %vm94_vm7, %v89_v22, %v91_v19  ;;  %v97_v24 = vsel %vm94_vm7, %v87_v43, %v89_v22  ;;  %v73_v28 = vsel %vm70_vm8, %v63_v46, %v65_v25  ;;  %v1805_v46 = vand.u32 127, %v492_v45 }
  0xda   :  { %358 = vmatprep.subr.mxu1 %v98_v23 }
  0xdb   :  { %359 = vmatpush1.msra.mxu1 %v97_v24  ;;  %v494_v47 = vadd.s32 128, %v1805_v46  ;;  %v1809_v48 = vmul.u32.u64.low 3214946280, %v1805_v46  ;;  %v1810_v49 = vmul.u32.u64.high 3214946280, %v1805_v46, %v1809_v48  ;;  %v495_v62 = vadd.s32 256, %v1805_v46 }
  0xdc   :  { %v67_v26 = vpop.permute.xlu0 %66 }
  0xdd   :  { %v74_v27 = vsel %vm70_vm8, %v65_v25, %v67_v26  ;;  %v1812_v50 = vmul.u32.u64.low 3214946280, %v494_v47  ;;  %v1813_v51 = vmul.u32.u64.high 3214946280, %v494_v47, %v1812_v50  ;;  %vm505_vm10 = vc.u32 %v1809_v48, 3214946280 }
  0xde   :  { %360 = vmatprep.subr.mxu1 %v74_v27 }
  0xdf   :  { %361 = vmatpush1.msra.mxu1 %v73_v28  ;;  %vm519_vm11 = vc.u32 %v1812_v50, 3214946280 }
  0xe0   :  { %362 = vmatprep.subr.mxu1 %v1657_v4 }
  0xe1   :  { %363 = vmatpush1.msra.mxu1 %v1601_v0 }
  0xe2   :  { %1417 = vmatmul.mubr.msk.f32.vlgmr.msra.gmra.mxu1 %vm257_vm9, %v1758_v52 }
  0xe3   :  { %1226 = vmatprep.mubr.f32.mxu1 %v1556_v3 }
 0x100   :  { %v237_v29 = vpop.permute.xlu1 %236  ;;  %v213_v30 = vpop.permute.xlu0 %212 }
 0x101   :  { %417 = vmatprep.subr.mxu0 %v237_v29  ;;  %v243_v31 = vsel %vm238_vm1, %v235_v54, %v237_v29  ;;  %v219_v32 = vsel %vm214_vm2, %v211_v58, %v213_v30 }
 0x102   :  { %418 = vmatpush1.msra.mxu0 %v243_v31 }
 0x103   :  { %419 = vmatprep.subr.mxu0 %v213_v30 }
 0x104   :  { %v189_v33 = vpop.permute.xlu1 %188  ;;  %420 = vmatpush1.msra.mxu0 %v219_v32  ;;  %v165_v34 = vpop.permute.xlu0 %164 }
 0x105   :  { %421 = vmatprep.subr.mxu0 %v189_v33  ;;  %v195_v35 = vsel %vm190_vm3, %v187_v57, %v189_v33  ;;  %v171_v36 = vsel %vm166_vm4, %v163_v11, %v165_v34 }
 0x106   :  { %422 = vmatpush1.msra.mxu0 %v195_v35 }
 0x107   :  { %423 = vmatprep.subr.mxu0 %v165_v34 }
 0x108   :  { %v141_v37 = vpop.permute.xlu1 %140  ;;  %424 = vmatpush1.msra.mxu0 %v171_v36  ;;  %v117_v38 = vpop.permute.xlu0 %116 }
 0x109   :  { %425 = vmatprep.subr.mxu0 %v141_v37  ;;  %v147_v39 = vsel %vm142_vm5, %v139_v8, %v141_v37  ;;  %v123_v40 = vsel %vm118_vm6, %v115_v18, %v117_v38  ;;  %v1821_v8 = vmul.u32.u64.low 3214946280, %v495_v62  ;;  %v1822_v11 = vmul.u32.u64.high 3214946280, %v495_v62, %v1821_v8 }
 0x10a   :  { %426 = vmatpush1.msra.mxu0 %v147_v39 }
 0x10b   :  { %427 = vmatprep.subr.mxu0 %v117_v38  ;;  %vm533_vm3 = vc.u32 %v1821_v8, 3214946280 }
 0x10c   :  { %v93_v41 = vpop.permute.xlu1 %92  ;;  %428 = vmatpush1.msra.mxu0 %v123_v40  ;;  %v69_v42 = vpop.permute.xlu0 %68  ;;  %v534_v16 = vsel %vm533_vm3, 1, %v1558_v6 }
 0x10d   :  { %429 = vmatprep.subr.mxu0 %v93_v41  ;;  %v99_v43 = vsel %vm94_vm7, %v91_v19, %v93_v41  ;;  %v75_v44 = vsel %vm70_vm8, %v67_v26, %v69_v42  ;;  %v535_v20 = vadd.s32 %v1822_v11, %v534_v16 }
 0x10e   :  { %430 = vmatpush1.msra.mxu0 %v99_v43 }
 0x10f   :  { %431 = vmatprep.subr.mxu0 %v69_v42  ;;  %v536_v23 = vshrl.u32 %v535_v20, 8 }
 0x110   :  { %432 = vmatpush1.msra.mxu0 %v75_v44 }
 0x111   :  { %433 = vmatprep.subr.mxu0 %v1696_v7  ;;  %v506_v7 = vsel %vm505_vm10, 1, %v1558_v6  ;;  %v537_v25 = vmul.u32 342, %v536_v23 }
 0x112   :  { %434 = vmatpush1.msra.mxu0 %v1663_v5  ;;  %v507_v53 = vadd.s32 %v1810_v49, %v506_v7 }
 0x113   :  { %1418 = vmatmul.mubr.msk.f32.vlgmr.msra.gmra.mxu0 %vm257_vm9, %v1758_v52  ;;  %v520_v52 = vsel %vm519_vm11, 1, %v1558_v6  ;;  %v538_v28 = vsub.s32 %v495_v62, %v537_v25 }
 0x114   :  { %1297 = vmatprep.mubr.f32.mxu0 %v1556_v3  ;;  %v521_v54 = vadd.s32 %v1813_v51, %v520_v52  ;;  %v508_v55 = vshrl.u32 %v507_v53, 8 }
 0x115   :  { %vm585_vm4 = vcmp.ne.s32.totalorder %v538_v28, 0  ;;  %vm591_vm5 = vcmp.lt.s32.totalorder %v538_v28, 0  ;;  %v603_v32 = vadd.s32 342, %v538_v28 }
 0x116   :  { %v522_v56 = vshrl.u32 %v521_v54, 8  ;;  %v509_v57 = vmul.u32 342, %v508_v55  ;;  %vm597_vm6 = vmand %vm591_vm5, %vm585_vm4 }
 0x117   :  { %v609_v35 = vsel %vm597_vm6, %v603_v32, %v538_v28 }
 0x118   :  { %v523_v58 = vmul.u32 342, %v522_v56  ;;  %v510_v59 = vsub.s32 %v1805_v46, %v509_v57  ;;  %v642_v37 = vsub.s32 0, %v609_v35 }
 0x119   :  { %v1837_v45 = vpop.permute.xlu1 %254 }
 0x11a   :  { %v524_v60 = vsub.s32 %v494_v47, %v523_v58  ;;  %vm583_vm12 = vcmp.ne.s32.totalorder %v510_v59, 0  ;;  %vm589_vm13 = vcmp.lt.s32.totalorder %v510_v59, 0  ;;  %v601_v61 = vadd.s32 342, %v510_v59 }
 0x11b   :  { %vm595_vm1 = vmand %vm589_vm13, %vm583_vm12  ;;  %v1421_v40 = vmin.u32 %v642_v37, %v609_v35 }
 0x11c   :  { %vm584_vm14 = vcmp.ne.s32.totalorder %v524_v60, 0  ;;  %vm590_vm15 = vcmp.lt.s32.totalorder %v524_v60, 0  ;;  %v602_v63 = vadd.s32 342, %v524_v60  ;;  %v607_v9 = vsel %vm595_vm1, %v601_v61, %v510_v59 }
 0x11d   :  { %vm596_vm2 = vmand %vm590_vm15, %vm584_vm14  ;;  %v620_v13 = vsub.s32 0, %v607_v9  ;;  %vm619_vm7 = vcmp.lt.s32.totalorder %v607_v9, 0  ;;  %v1834_v43 = vmul.u32.u64.low 3817748708, %v1421_v40  ;;  %v1835_v44 = vmul.u32.u64.high 3817748708, %v1421_v40, %v1834_v43 }
 0x11e   :  { %v608_v12 = vsel %vm596_vm2, %v602_v63, %v524_v60  ;;  %vm613_vm15 = vcmp.lt.s32.totalorder %v607_v9, 288 }
 0x11f   :  { %v631_v14 = vsub.s32 0, %v608_v12  ;;  %v1419_v15 = vmin.u32 %v620_v13, %v607_v9  ;;  %vm630_vm8 = vcmp.lt.s32.totalorder %v608_v12, 0  ;;  %vm614_vm2 = vcmp.lt.s32.totalorder %v608_v12, 288 }
 0x120   :  { %v647_v54 = vshrl.u32 %v1835_v44, 4  ;;  %v497_v13 = vadd.s32 512, %v1805_v46 }
 0x121   :  { %v1420_v17 = vmin.u32 %v631_v14, %v608_v12  ;;  %v1825_v18 = vmul.u32.u64.low 3817748708, %v1419_v15  ;;  %v1826_v19 = vmul.u32.u64.high 3817748708, %v1419_v15, %v1825_v18 }
 0x122   :  { %v648_v58 = vmul.u32 18, %v647_v54 }
 0x123   :  { %v1829_v21 = vmul.u32.u64.low 3817748708, %v1420_v17  ;;  %v1830_v22 = vmul.u32.u64.high 3817748708, %v1420_v17, %v1829_v21  ;;  %v625_v24 = vshrl.u32 %v1826_v19, 4 }
 0x124   :  { %v649_v59 = vsub.s32 %v1421_v40, %v648_v58 }
 0x125   :  { %v636_v26 = vshrl.u32 %v1830_v22, 4  ;;  %v626_v27 = vmul.u32 18, %v625_v24 }
 0x126   :  { %v650_v60 = vsub.s32 0, %v649_v59 }
 0x127   :  { %v637_v29 = vmul.u32 18, %v636_v26  ;;  %v627_v30 = vsub.s32 %v1419_v15, %v626_v27  ;;  %v1864_v15 = vmul.u32.u64.low 3214946280, %v497_v13  ;;  %v1865_v16 = vmul.u32.u64.high 3214946280, %v497_v13, %v1864_v15 }
 0x129   :  { %v638_v31 = vsub.s32 %v1420_v17, %v637_v29  ;;  %v628_v33 = vsub.s32 0, %v627_v30  ;;  %v498_v17 = vadd.s32 640, %v1805_v46 }
 0x12b   :  { %v639_v34 = vsub.s32 0, %v638_v31  ;;  %v629_v36 = vsel %vm619_vm7, %v628_v33, %v627_v30 }
 0x12c   :  { %vm685_vm9 = vcmp.ne.s32.totalorder %v629_v36, 0  ;;  %vm691_vm10 = vcmp.lt.s32.totalorder %v629_v36, 0  ;;  %v703_v39 = vadd.s32 18, %v629_v36 }
 0x12d   :  { %v640_v38 = vsel %vm630_vm8, %v639_v34, %v638_v31  ;;  %vm697_vm13 = vmand %vm691_vm10, %vm685_vm9  ;;  %vm641_vm8 = vcmp.lt.s32.totalorder %v609_v35, 0 }
 0x12e   :  { %vm686_vm11 = vcmp.ne.s32.totalorder %v640_v38, 0  ;;  %vm692_vm12 = vcmp.lt.s32.totalorder %v640_v38, 0  ;;  %v704_v41 = vadd.s32 18, %v640_v38  ;;  %v709_v42 = vsel %vm697_vm13, %v703_v39, %v629_v36 }
 0x12f   :  { %vm698_vm14 = vmand %vm692_vm12, %vm686_vm11  ;;  %vm715_vm1 = vcmp.lt.s32.totalorder %v709_v42, 16  ;;  %v651_v61 = vsel %vm641_vm8, %v650_v60, %v649_v59  ;;  %vm615_vm12 = vcmp.lt.s32.totalorder %v609_v35, 288 }
 0x130   :  { %v710_v47 = vsel %vm698_vm14, %v704_v41, %v640_v38  ;;  %vm721_vm5 = vmand %vm613_vm15, %vm715_vm1  ;;  %vm687_vm9 = vcmp.ne.s32.totalorder %v651_v61, 0  ;;  %vm693_vm10 = vcmp.lt.s32.totalorder %v651_v61, 0  ;;  %v705_v62 = vadd.s32 18, %v651_v61 }
 0x131   :  { %vm716_vm3 = vcmp.lt.s32.totalorder %v710_v47, 16  ;;  %vm699_vm11 = vmand %vm693_vm10, %vm687_vm9 }
 0x132   :  { %vm722_vm7 = vmand %vm614_vm2, %vm716_vm3  ;;  %v711_v63 = vsel %vm699_vm11, %v705_v62, %v651_v61  ;;  %vm561_vm2 = vc.u32 %v1864_v15, 3214946280 }
 0x133   :  { %vm717_vm13 = vcmp.lt.s32.totalorder %v711_v63, 16  ;;  %v562_v20 = vsel %vm561_vm2, 1, %v1558_v6 }
 0x134   :  { %vm723_vm15 = vmand %vm615_vm12, %vm717_vm13  ;;  %v563_v21 = vadd.s32 %v1865_v16, %v562_v20 }
 0x136   :  { %v564_v24 = vshrl.u32 %v563_v21, 8 }
 0x181   :  { %v327_v48 = vpop.f32.mrf.mxu0 }
 0x182   :  { %v328_v49 = vadd.f32 %v327_v48, %v1837_v45 }
 0x183   :  { %v329_v50 = vpop.f32.mrf.mxu0 }
 0x184   :  { %v480_v51 = vmul.f32 0.1, %v328_v49  ;;  %v330_v7 = vadd.f32 %v329_v50, %v1837_v45  ;;  %vm474_vm4 = vcmp.gt.f32.partialorder %v328_v49, 0.0 }
 0x186   :  { %v481_v52 = vmul.f32 0.1, %v330_v7  ;;  %v486_v53 = vsel %vm474_vm4, %v328_v49, %v480_v51  ;;  %vm475_vm6 = vcmp.gt.f32.partialorder %v330_v7, 0.0 }
 0x187   :  { %v727_v55 = vsel %vm721_vm5, %v486_v53, 0.0 }
 0x188   :  { %733 = vrot.lane.b32.xlu0 %v727_v55, %s1549_s25  ;;  %v487_v56 = vsel %vm475_vm6, %v330_v7, %v481_v52 }
 0x189   :  { %v728_v57 = vsel %vm722_vm7, %v487_v56, 0.0 }
 0x18a   :  { %736 = vrot.lane.b32.xlu1 %v728_v57, %s1549_s25 }
 0x18e   :  { %925 = vrot.lane.b32.xlu1 %v1603_v1, %s1559_s1 }
 0x192   :  { %929 = vrot.lane.b32.xlu1 %v1601_v0, %s1559_s1 }
 0x196   :  { %931 = vrot.lane.b32.xlu1 %v1657_v4, %s1559_s1  ;;  %v496_v4 = vadd.s32 384, %v1805_v46  ;;  %v565_v46 = vmul.u32 342, %v564_v24 }
 0x198   :  { %v566_v29 = vsub.s32 %v497_v13, %v565_v46 }
 0x19a   :  { %935 = vrot.lane.b32.xlu1 %v1702_v10, %s1559_s1  ;;  %v1859_v10 = vmul.u32.u64.low 3214946280, %v496_v4  ;;  %v1860_v12 = vmul.u32.u64.high 3214946280, %v496_v4, %v1859_v10  ;;  %vm587_vm7 = vcmp.ne.s32.totalorder %v566_v29, 0  ;;  %vm593_vm8 = vcmp.lt.s32.totalorder %v566_v29, 0 }
 0x19b   :  { %vm599_vm9 = vmand %vm593_vm8, %vm587_vm7 }
 0x19c   :  { %vm547_vm1 = vc.u32 %v1859_v10, 3214946280 }
 0x19d   :  { %v548_v14 = vsel %vm547_vm1, 1, %v1558_v6 }
 0x1a2   :  { %v398_v9 = vpop.f32.mrf.mxu1 }
 0x1a3   :  { %v399_v1 = vadd.f32 %v398_v9, %v1837_v45 }
 0x1a4   :  { %v400_v63 = vpop.f32.mrf.mxu1 }
 0x1a5   :  { %v482_v0 = vmul.f32 0.1, %v399_v1  ;;  %vm476_vm14 = vcmp.gt.f32.partialorder %v399_v1, 0.0 }
 0x1a7   :  { %v488_v8 = vsel %vm476_vm14, %v399_v1, %v482_v0 }
 0x1a8   :  { %v729_v11 = vsel %vm723_vm15, %v488_v8, 0.0  ;;  %v401_v8 = vadd.f32 %v400_v63, %v1837_v45 }
 0x1a9   :  { %738 = vrot.lane.b32.xlu0 %v729_v11, %s1549_s25 }
 0x1aa   :  { %vm477_vm7 = vcmp.gt.f32.partialorder %v401_v8, 0.0 }
 0x1ad   :  { %927 = vrot.lane.b32.xlu0 %v1609_v2, %s1559_s1  ;;  %v549_v2 = vadd.s32 %v1860_v12, %v548_v14  ;;  %v483_v14 = vmul.f32 0.1, %v401_v8 }
 0x1af   :  { %v550_v19 = vshrl.u32 %v549_v2, 8  ;;  %v489_v24 = vsel %vm477_vm7, %v401_v8, %v483_v14 }
 0x1b1   :  { %933 = vrot.lane.b32.xlu0 %v1663_v5, %s1559_s1  ;;  %v1869_v18 = vmul.u32.u64.low 3214946280, %v498_v17  ;;  %v1870_v5 = vmul.u32.u64.high 3214946280, %v498_v17, %v1869_v18  ;;  %v551_v22 = vmul.u32 342, %v550_v19 }
 0x1b3   :  { %vm575_vm3 = vc.u32 %v1869_v18, 3214946280  ;;  %v552_v26 = vsub.s32 %v496_v4, %v551_v22 }
 0x1b4   :  { %v576_v23 = vsel %vm575_vm3, 1, %v1558_v6  ;;  %v605_v6 = vadd.s32 342, %v566_v29 }
 0x1b5   :  { %v577_v25 = vadd.s32 %v1870_v5, %v576_v23  ;;  %vm586_vm4 = vcmp.ne.s32.totalorder %v552_v26, 0  ;;  %vm592_vm5 = vcmp.lt.s32.totalorder %v552_v26, 0  ;;  %v604_v28 = vadd.s32 342, %v552_v26 }
 0x1b6   :  { %vm598_vm6 = vmand %vm592_vm5, %vm586_vm4  ;;  %v1880_v35 = vsel %vm599_vm9, %v605_v6, %v566_v29  ;;  %vm847_vm5 = vcmask 48128  }
 0x1b7   :  { %v578_v27 = vshrl.u32 %v577_v25, 8  ;;  %v1876_v31 = vsel %vm598_vm6, %v604_v28, %v552_v26  ;;  %v664_v37 = vsub.s32 0, %v1880_v35  ;;  %vm663_vm1 = vcmp.lt.s32.totalorder %v1880_v35, 0 }
 0x1b8   :  { %v653_v33 = vsub.s32 0, %v1876_v31  ;;  %vm652_vm13 = vcmp.lt.s32.totalorder %v1876_v31, 0  ;;  %vm616_vm8 = vcmp.lt.s32.totalorder %v1876_v31, 288 }
 0x1b9   :  { %v579_v30 = vmul.u32 342, %v578_v27  ;;  %v1423_v41 = vmin.u32 %v664_v37, %v1880_v35 }
 0x1ba   :  { %v1422_v34 = vmin.u32 %v653_v33, %v1876_v31 }
 0x1bb   :  { %v580_v32 = vsub.s32 %v498_v17, %v579_v30  ;;  %v1890_v43 = vmul.u32.u64.low 3817748708, %v1423_v41  ;;  %v1891_v44 = vmul.u32.u64.high 3817748708, %v1423_v41, %v1890_v43 }
 0x1bc   :  { %v1883_v38 = vmul.u32.u64.low 3817748708, %v1422_v34  ;;  %v1884_v39 = vmul.u32.u64.high 3817748708, %v1422_v34, %v1883_v38 }
 0x1bd   :  { %vm588_vm10 = vcmp.ne.s32.totalorder %v580_v32, 0  ;;  %vm594_vm11 = vcmp.lt.s32.totalorder %v580_v32, 0  ;;  %v606_v36 = vadd.s32 342, %v580_v32  ;;  %v669_v7 = vshrl.u32 %v1891_v44, 4 }
 0x1be   :  { %vm600_vm12 = vmand %vm594_vm11, %vm588_vm10  ;;  %v658_v48 = vshrl.u32 %v1884_v39, 4 }
 0x1bf   :  { %v1886_v40 = vsel %vm600_vm12, %v606_v36, %v580_v32  ;;  %v670_v53 = vmul.u32 18, %v669_v7 }
 0x1c0   :  { %v675_v42 = vsub.s32 0, %v1886_v40  ;;  %v659_v51 = vmul.u32 18, %v658_v48  ;;  %vm674_vm3 = vcmp.lt.s32.totalorder %v1886_v40, 0 }
 0x1c1   :  { %v671_v57 = vsub.s32 %v1423_v41, %v670_v53 }
 0x1c2   :  { %v1424_v47 = vmin.u32 %v675_v42, %v1886_v40  ;;  %v660_v52 = vsub.s32 %v1422_v34, %v659_v51 }
 0x1c3   :  { %v672_v61 = vsub.s32 0, %v671_v57 }
 0x1c4   :  { %v1895_v49 = vmul.u32.u64.low 3817748708, %v1424_v47  ;;  %v1896_v50 = vmul.u32.u64.high 3817748708, %v1424_v47, %v1895_v49  ;;  %v661_v55 = vsub.s32 0, %v660_v52 }
 0x1c5   :  { %v673_v11 = vsel %vm663_vm1, %v672_v61, %v671_v57  ;;  %vm617_vm1 = vcmp.lt.s32.totalorder %v1880_v35, 288 }
 0x1c6   :  { %v680_v54 = vshrl.u32 %v1896_v50, 4  ;;  %v662_v59 = vsel %vm652_vm13, %v661_v55, %v660_v52  ;;  %vm689_vm4 = vcmp.ne.s32.totalorder %v673_v11, 0  ;;  %vm695_vm6 = vcmp.lt.s32.totalorder %v673_v11, 0 }
 0x1c7   :  { %vm688_vm14 = vcmp.ne.s32.totalorder %v662_v59, 0  ;;  %vm694_vm15 = vcmp.lt.s32.totalorder %v662_v59, 0  ;;  %v706_v1 = vadd.s32 18, %v662_v59  ;;  %v707_v18 = vadd.s32 18, %v673_v11  ;;  %vm1923_vm10 = vmand %vm695_vm6, %vm689_vm4 }
 0x1c8   :  { %v681_v58 = vmul.u32 18, %v680_v54  ;;  %vm1906_vm2 = vmand %vm694_vm15, %vm688_vm14  ;;  %vm618_vm6 = vcmp.lt.s32.totalorder %v1886_v40, 288 }
 0x1c9   :  { %v712_v13 = vsel %vm1906_vm2, %v706_v1, %v662_v59  ;;  %v713_v46 = vsel %vm1923_vm10, %v707_v18, %v673_v11  ;;  %vm865_vm10 = vcmask 39936  }
 0x1ca   :  { %v682_v62 = vsub.s32 %v1424_v47, %v681_v58  ;;  %vm1917_vm9 = vcmp.lt.s32.totalorder %v712_v13, 16  ;;  %vm719_vm2 = vcmp.lt.s32.totalorder %v713_v46, 16 }
 0x1cb   :  { %vm724_vm13 = vmand %vm616_vm8, %vm1917_vm9  ;;  %vm769_vm9 = vcmask 842752  }
 0x1cc   :  { %v683_v4 = vsub.s32 0, %v682_v62  ;;  %v730_v29 = vsel %vm724_vm13, %v489_v24, 0.0  ;;  %vm725_vm4 = vmand %vm617_vm1, %vm719_vm2  ;;  %vm811_vm13 = vcmask 187392  }
 0x1ce   :  { %v684_v16 = vsel %vm674_vm3, %v683_v4, %v682_v62 }
 0x1cf   :  { %vm690_vm11 = vcmp.ne.s32.totalorder %v684_v16, 0  ;;  %vm696_vm12 = vcmp.lt.s32.totalorder %v684_v16, 0  ;;  %v708_v26 = vadd.s32 18, %v684_v16 }
 0x1d0   :  { %vm1938_vm14 = vmand %vm696_vm12, %vm690_vm11  ;;  %vm829_vm11 = vcmask 56320   ;;  %vm919_vm12 = vcmask 941056  }
 0x1d1   :  { %v714_v31 = vsel %vm1938_vm14, %v708_v26, %v684_v16  ;;  %vm793_vm14 = vcmask 195584  }
 0x1d2   :  { %vm720_vm7 = vcmp.lt.s32.totalorder %v714_v31, 16 }
 0x1d3   :  { %v469_v15 = vpop.f32.mrf.mxu0  ;;  %vm726_vm8 = vmand %vm618_vm6, %vm720_vm7  ;;  %vm1398_vm7 = vcmask 359424  }
 0x1d4   :  { %v470_v21 = vadd.f32 %v469_v15, %v1837_v45 }
 0x1d5   :  { %v471_v22 = vpop.f32.mrf.mxu0 }
 0x1d6   :  { %v472_v28 = vadd.f32 %v471_v22, %v1837_v45  ;;  %v484_v30 = vmul.f32 0.1, %v470_v21  ;;  %vm478_vm15 = vcmp.gt.f32.partialorder %v470_v21, 0.0 }
 0x1d8   :  { %v485_v6 = vmul.f32 0.1, %v472_v28  ;;  %vm479_vm3 = vcmp.gt.f32.partialorder %v472_v28, 0.0  ;;  %v490_v45 = vsel %vm478_vm15, %v470_v21, %v484_v30  ;;  %vm883_vm15 = vcmask 957440  }
 0x1d9   :  { %v731_v36 = vsel %vm725_vm4, %v490_v45, 0.0 }
 0x1da   :  { %v491_v37 = vsel %vm479_vm3, %v472_v28, %v485_v6 }
 0x1db   :  { %v732_v38 = vsel %vm726_vm8, %v491_v37, 0.0 }
 0x1fa   :  { %v1904_v9 = vpop.permute.xlu0 %733 }
 0x1fb   :  { %v735_v39 = vsel %vm48_vm0, %v1904_v9, %v732_v38 }
 0x1fc   :  { %v1900_v56 = vpop.permute.xlu1 %736 }
 0x1fd   :  { %v746_v41 = vsel %vm48_vm0, %v1900_v56, %v1904_v9 }
 0x200   :  { %v926_v60 = vpop.permute.xlu1 %925 }
 0x204   :  { %v930_v10 = vpop.permute.xlu1 %929 }
 0x208   :  { %v932_v23 = vpop.permute.xlu1 %931 }
 0x209   :  { %v939_v25 = vsel %vm847_vm5, %v930_v10, %v932_v23 }
 0x20c   :  { %v936_v33 = vpop.permute.xlu1 %935 }
 0x21b   :  { %v1912_v12 = vpop.permute.xlu0 %738 }
 0x21c   :  { %v747_v40 = vsel %vm48_vm0, %v1912_v12, %v1900_v56 }
 0x21f   :  { %v928_v2 = vpop.permute.xlu0 %927 }
 0x220   :  { %v938_v5 = vsel %vm847_vm5, %v928_v2, %v930_v10  ;;  %v937_v19 = vsel %vm847_vm5, %v926_v60, %v928_v2 }
 0x221   :  { %1047 = vrot.lane.b32.xlu0 %v938_v5, %s1560_s10  ;;  %1045 = vrot.lane.b32.xlu1 %v937_v19, %s1560_s10 }
 0x223   :  { %v934_v32 = vpop.permute.xlu0 %933 }
 0x224   :  { %v941_v34 = vsel %vm847_vm5, %v934_v32, %v936_v33  ;;  %v940_v35 = vsel %vm847_vm5, %v932_v23, %v934_v32 }
 0x225   :  { %1049 = vrot.lane.b32.xlu0 %v939_v25, %s1560_s10  ;;  %740 = vrot.lane.b32.xlu1 %v730_v29, %s1549_s25 }
 0x229   :  { %1043 = vrot.lane.b32.xlu1 %v926_v60, %s1560_s10  ;;  %1053 = vrot.lane.b32.xlu0 %v941_v34, %s1560_s10 }
 0x22d   :  { %742 = vrot.lane.b32.xlu0 %v731_v36, %s1549_s25  ;;  %1051 = vrot.lane.b32.xlu1 %v940_v35, %s1560_s10 }
 0x231   :  { %757 = vrot.lane.b32.xlu0 %v735_v39, %s1560_s10  ;;  %744 = vrot.lane.b32.xlu1 %v735_v39, %s1549_s25 }
 0x235   :  { %761 = vrot.lane.b32.xlu0 %v747_v40, %s1560_s10  ;;  %759 = vrot.lane.b32.xlu1 %v746_v41, %s1560_s10 }
 0x293   :  { %v1046_v42 = vpop.permute.xlu1 %1045  ;;  %v1048_v43 = vpop.permute.xlu0 %1047 }
 0x294   :  { %v1096_v44 = vsel %vm769_vm9, %v1046_v42, %v1048_v43 }
 0x295   :  { %1174 = vmatprep.subr.mxu1 %v1096_v44 }
 0x297   :  { %v741_v47 = vpop.permute.xlu1 %740  ;;  %v1050_v48 = vpop.permute.xlu0 %1049 }
 0x298   :  { %v748_v49 = vsel %vm48_vm0, %v741_v47, %v1912_v12  ;;  %v1097_v56 = vsel %vm769_vm9, %v1048_v43, %v1050_v48 }
 0x299   :  { %763 = vrot.lane.b32.xlu1 %v748_v49, %s1560_s10 }
 0x29b   :  { %v1044_v50 = vpop.permute.xlu1 %1043  ;;  %v1971_v51 = vpop.permute.xlu0 %1053 }
 0x29c   :  { %v1095_v7 = vsel %vm769_vm9, %v1044_v50, %v1046_v42 }
 0x29d   :  { %1175 = vmatpush1.msra.mxu1 %v1095_v7 }
 0x29f   :  { %v1974_v52 = vpop.permute.xlu1 %1051  ;;  %v743_v53 = vpop.permute.xlu0 %742 }
 0x2a0   :  { %v1098_v54 = vsel %vm769_vm9, %v1050_v48, %v1974_v52  ;;  %v749_v55 = vsel %vm48_vm0, %v743_v53, %v741_v47 }
 0x2a1   :  { %1245 = vmatprep.subr.mxu0 %v1098_v54  ;;  %765 = vrot.lane.b32.xlu0 %v749_v55, %s1560_s10 }
 0x2a2   :  { %1246 = vmatpush1.msra.mxu0 %v1097_v56 }
 0x2a3   :  { %v745_v57 = vpop.permute.xlu1 %744  ;;  %v758_v58 = vpop.permute.xlu0 %757 }
 0x2a4   :  { %v750_v59 = vsel %vm48_vm0, %v745_v57, %v743_v53 }
 0x2a5   :  { %767 = vrot.lane.b32.xlu1 %v750_v59, %s1560_s10 }
 0x2a7   :  { %v760_v60 = vpop.permute.xlu1 %759  ;;  %v762_v62 = vpop.permute.xlu0 %761 }
 0x2a8   :  { %v1984_v61 = vsel %vm769_vm9, %v758_v58, %v760_v60  ;;  %v1989_v63 = vsel %vm769_vm9, %v760_v60, %v762_v62 }
 0x2a9   :  { %777 = vrot.lane.b32.xlu0 %v1984_v61, %s1549_s25 }
 0x2ad   :  { %909 = vrot.lane.b32.xlu0 %v1989_v63, %s1561_s11 }
 0x2b1   :  { %891 = vrot.lane.b32.xlu0 %v1989_v63, %s1562_s12 }
 0x2b5   :  { %873 = vrot.lane.b32.xlu0 %v1989_v63, %s1563_s13 }
 0x2b9   :  { %853 = vrot.lane.b32.xlu0 %v1984_v61, %s1564_s14 }
 0x30b   :  { %v764_v9 = vpop.permute.xlu1 %763 }
 0x30c   :  { %v2000_v1 = vsel %vm769_vm9, %v762_v62, %v764_v9 }
 0x30d   :  { %911 = vrot.lane.b32.xlu1 %v2000_v1, %s1561_s11  ;;  %857 = vrot.lane.b32.xlu0 %v2000_v1, %s1564_s14 }
 0x311   :  { %907 = vrot.lane.b32.xlu1 %v1984_v61, %s1561_s11  ;;  %837 = vrot.lane.b32.xlu0 %v1989_v63, %s1559_s1 }
 0x313   :  { %v766_v0 = vpop.permute.xlu0 %765 }
 0x314   :  { %v2031_v8 = vsel %vm769_vm9, %v764_v9, %v766_v0 }
 0x315   :  { %893 = vrot.lane.b32.xlu1 %v2000_v1, %s1562_s12  ;;  %817 = vrot.lane.b32.xlu0 %v1984_v61, %s1565_s15 }
 0x317   :  { %v2066_v14 = vpop.permute.xlu1 %767 }
 0x318   :  { %v2101_v30 = vsel %vm769_vm9, %v766_v0, %v2066_v14 }
 0x319   :  { %889 = vrot.lane.b32.xlu1 %v1984_v61, %s1562_s12  ;;  %821 = vrot.lane.b32.xlu0 %v2000_v1, %s1565_s15 }
 0x31b   :  { %v778_v11 = vpop.permute.xlu0 %777 }
 0x31c   :  { %v779_v25 = vsel %vm48_vm0, %v778_v11, %v2066_v14  ;;  %vm901_vm0 = vcmask 949248  }
 0x31d   :  { %875 = vrot.lane.b32.xlu1 %v2000_v1, %s1563_s13  ;;  %801 = vrot.lane.b32.xlu0 %v1989_v63, %s1566_s16 }
 0x31f   :  { %v2049_v4 = vpop.permute.xlu0 %909 }
 0x321   :  { %871 = vrot.lane.b32.xlu1 %v1984_v61, %s1563_s13  ;;  %781 = vrot.lane.b32.xlu0 %v1984_v61, %s1567_s17 }
 0x323   :  { %v892_v10 = vpop.permute.xlu0 %891 }
 0x325   :  { %855 = vrot.lane.b32.xlu1 %v1989_v63, %s1564_s14  ;;  %785 = vrot.lane.b32.xlu0 %v2000_v1, %s1567_s17 }
 0x327   :  { %v2061_v12 = vpop.permute.xlu0 %873 }
 0x329   :  { %835 = vrot.lane.b32.xlu1 %v1984_v61, %s1559_s1  ;;  %913 = vrot.lane.b32.xlu0 %v2031_v8, %s1561_s11 }
 0x32b   :  { %v854_v13 = vpop.permute.xlu0 %853 }
 0x32d   :  { %839 = vrot.lane.b32.xlu1 %v2000_v1, %s1559_s1  ;;  %895 = vrot.lane.b32.xlu0 %v2031_v8, %s1562_s12 }
 0x331   :  { %819 = vrot.lane.b32.xlu1 %v1989_v63, %s1565_s15  ;;  %877 = vrot.lane.b32.xlu0 %v2031_v8, %s1563_s13 }
 0x335   :  { %799 = vrot.lane.b32.xlu1 %v1984_v61, %s1566_s16  ;;  %859 = vrot.lane.b32.xlu0 %v2031_v8, %s1564_s14 }
 0x339   :  { %803 = vrot.lane.b32.xlu1 %v2000_v1, %s1566_s16  ;;  %823 = vrot.lane.b32.xlu0 %v2031_v8, %s1565_s15 }
 0x33d   :  { %783 = vrot.lane.b32.xlu1 %v1989_v63, %s1567_s17  ;;  %787 = vrot.lane.b32.xlu0 %v2031_v8, %s1567_s17 }
 0x341   :  { %841 = vrot.lane.b32.xlu1 %v2031_v8, %s1559_s1 }
 0x345   :  { %805 = vrot.lane.b32.xlu1 %v2031_v8, %s1566_s16 }
 0x349   :  { %995 = vrot.lane.b32.xlu1 %v854_v13, %s1560_s10 }
 0x37f   :  { %v2068_v15 = vpop.permute.xlu1 %911  ;;  %v2070_v16 = vpop.permute.xlu0 %857 }
 0x380   :  { %v921_v39 = vsel %vm919_vm12, %v2049_v4, %v2068_v15 }
 0x383   :  { %v2072_v17 = vpop.permute.xlu1 %907  ;;  %v838_v2 = vpop.permute.xlu0 %837 }
 0x384   :  { %v920_v43 = vsel %vm919_vm12, %v2072_v17, %v2049_v4 }
 0x387   :  { %v2074_v18 = vpop.permute.xlu1 %893  ;;  %v818_v5 = vpop.permute.xlu0 %817 }
 0x388   :  { %971 = vrot.lane.b32.xlu1 %v818_v5, %s1560_s10  ;;  %v903_v33 = vsel %vm901_vm0, %v892_v10, %v2074_v18 }
 0x38b   :  { %v890_v19 = vpop.permute.xlu1 %889  ;;  %v2077_v20 = vpop.permute.xlu0 %821 }
 0x38c   :  { %v902_v6 = vsel %vm901_vm0, %v890_v19, %v892_v10 }
 0x38f   :  { %v2079_v21 = vpop.permute.xlu1 %875  ;;  %v2081_v22 = vpop.permute.xlu0 %801 }
 0x390   :  { %v885_v47 = vsel %vm883_vm15, %v2061_v12, %v2079_v21 }
 0x393   :  { %v2083_v23 = vpop.permute.xlu1 %871  ;;  %v782_v24 = vpop.permute.xlu0 %781 }
 0x394   :  { %947 = vrot.lane.b32.xlu1 %v782_v24, %s1560_s10  ;;  %v884_v7 = vsel %vm883_vm15, %v2083_v23, %v2061_v12 }
 0x397   :  { %v856_v26 = vpop.permute.xlu1 %855  ;;  %v786_v45 = vpop.permute.xlu0 %785 }
 0x398   :  { %v2090_v46 = vsel %vm865_vm10, %v856_v26, %v2070_v16  ;;  %917 = vrot.lane.b32.xlu1 %v779_v25, %s1561_s11  ;;  %v866_v34 = vsel %vm865_vm10, %v854_v13, %v856_v26 }
 0x39b   :  { %v836_v27 = vpop.permute.xlu1 %835  ;;  %v2140_v38 = vpop.permute.xlu0 %913 }
 0x39c   :  { %v2094_v28 = vsel %vm847_vm5, %v836_v27, %v838_v2  ;;  %983 = vrot.lane.b32.xlu0 %v836_v27, %s1560_s10  ;;  %899 = vrot.lane.b32.xlu1 %v779_v25, %s1562_s12  ;;  %v922_v48 = vsel %vm919_vm12, %v2068_v15, %v2140_v38 }
 0x39f   :  { %v840_v29 = vpop.permute.xlu1 %839  ;;  %v896_v42 = vpop.permute.xlu0 %895 }
 0x3a0   :  { %881 = vrot.lane.b32.xlu1 %v779_v25, %s1563_s13  ;;  %v849_v35 = vsel %vm847_vm5, %v838_v2, %v840_v29  ;;  %v904_v62 = vsel %vm901_vm0, %v2074_v18, %v896_v42 }
 0x3a3   :  { %v2103_v32 = vpop.permute.xlu1 %819  ;;  %v878_v49 = vpop.permute.xlu0 %877 }
 0x3a4   :  { %861 = vrot.lane.b32.xlu1 %v2101_v30, %s1564_s14  ;;  %v830_v37 = vsel %vm829_vm11, %v818_v5, %v2103_v32  ;;  %v886_v53 = vsel %vm883_vm15, %v2079_v21, %v878_v49  ;;  %v831_v57 = vsel %vm829_vm11, %v2103_v32, %v2077_v20 }
 0x3a7   :  { %v2107_v31 = vpop.permute.xlu1 %799  ;;  %v860_v60 = vpop.permute.xlu0 %859 }
 0x3a8   :  { %959 = vrot.lane.b32.xlu0 %v2107_v31, %s1560_s10  ;;  %845 = vrot.lane.b32.xlu1 %v779_v25, %s1559_s1  ;;  %v812_v58 = vsel %vm811_vm13, %v2107_v31, %v2081_v22  ;;  %v868_v0 = vsel %vm865_vm10, %v2070_v16, %v860_v60 }
 0x3ab   :  { %v804_v36 = vpop.permute.xlu1 %803  ;;  %v824_v9 = vpop.permute.xlu0 %823 }
 0x3ac   :  { %915 = vrot.lane.b32.xlu0 %v2101_v30, %s1561_s11  ;;  %825 = vrot.lane.b32.xlu1 %v2101_v30, %s1565_s15  ;;  %v813_v40 = vsel %vm811_vm13, %v2081_v22, %v804_v36  ;;  %v832_v11 = vsel %vm829_vm11, %v2077_v20, %v824_v9 }
 0x3af   :  { %v784_v41 = vpop.permute.xlu1 %783  ;;  %v2204_v4 = vpop.permute.xlu0 %787 }
 0x3b0   :  { %897 = vrot.lane.b32.xlu0 %v2101_v30, %s1562_s12  ;;  %809 = vrot.lane.b32.xlu1 %v779_v25, %s1566_s16  ;;  %v794_v44 = vsel %vm793_vm14, %v782_v24, %v784_v41  ;;  %v795_v59 = vsel %vm793_vm14, %v784_v41, %v786_v45  ;;  %v796_v10 = vsel %vm793_vm14, %v786_v45, %v2204_v4 }
 0x3b3   :  { %v2165_v50 = vpop.permute.xlu1 %841 }
 0x3b4   :  { %879 = vrot.lane.b32.xlu0 %v2101_v30, %s1563_s13  ;;  %789 = vrot.lane.b32.xlu1 %v2101_v30, %s1567_s17  ;;  %v850_v54 = vsel %vm847_vm5, %v840_v29, %v2165_v50 }
 0x3b7   :  { %v2176_v55 = vpop.permute.xlu1 %805 }
 0x3b8   :  { %863 = vrot.lane.b32.xlu0 %v779_v25, %s1564_s14  ;;  %1021 = vrot.lane.b32.xlu1 %v903_v33, %s1560_s10  ;;  %v814_v56 = vsel %vm811_vm13, %v804_v36, %v2176_v55 }
 0x3bb   :  { %v2210_v12 = vpop.permute.xlu1 %995 }
 0x3bc   :  { %843 = vrot.lane.b32.xlu0 %v2101_v30, %s1559_s1  ;;  %1019 = vrot.lane.b32.xlu1 %v902_v6, %s1560_s10 }
 0x3c0   :  { %827 = vrot.lane.b32.xlu0 %v779_v25, %s1565_s15  ;;  %997 = vrot.lane.b32.xlu1 %v866_v34, %s1560_s10 }
 0x3c4   :  { %807 = vrot.lane.b32.xlu0 %v2101_v30, %s1566_s16  ;;  %987 = vrot.lane.b32.xlu1 %v849_v35, %s1560_s10 }
 0x3c8   :  { %791 = vrot.lane.b32.xlu0 %v779_v25, %s1567_s17  ;;  %973 = vrot.lane.b32.xlu1 %v830_v37, %s1560_s10 }
 0x3cc   :  { %1033 = vrot.lane.b32.xlu0 %v921_v39, %s1560_s10  ;;  %963 = vrot.lane.b32.xlu1 %v813_v40, %s1560_s10 }
 0x3d0   :  { %1031 = vrot.lane.b32.xlu0 %v920_v43, %s1560_s10  ;;  %949 = vrot.lane.b32.xlu1 %v794_v44, %s1560_s10  ;;  %v1568_v43 = vmov 1  }
 0x3d1   :  { %1477 = vset.pattern.permute.xlu1 %v1568_v43  ;;  %1478 = vset.pattern.permute.xlu0 %v1568_v43 }
 0x3d4   :  { %1009 = vrot.lane.b32.xlu0 %v885_v47, %s1560_s10  ;;  %1035 = vrot.lane.b32.xlu1 %v922_v48, %s1560_s10 }
 0x3d8   :  { %1007 = vrot.lane.b32.xlu0 %v884_v7, %s1560_s10  ;;  %1011 = vrot.lane.b32.xlu1 %v886_v53, %s1560_s10 }
 0x3dc   :  { %999 = vrot.lane.b32.xlu0 %v2090_v46, %s1560_s10  ;;  %989 = vrot.lane.b32.xlu1 %v850_v54, %s1560_s10 }
 0x3e0   :  { %985 = vrot.lane.b32.xlu0 %v2094_v28, %s1560_s10  ;;  %965 = vrot.lane.b32.xlu1 %v814_v56, %s1560_s10 }
 0x3e4   :  { %975 = vrot.lane.b32.xlu0 %v831_v57, %s1560_s10  ;;  %v1479_v57 = vld [vmem:[%s2368_s3] sm:$0xff]  ;;  %s1569_s3 = smov [#allocation7]  }
 0x3e5   :  { %s1406_s20 = sshll.u32 %s1569_s3, 4  ;;  %s1407_s20 = int_to_ptr.vmem [resolvable:$true] %s1406_s20 }
 0x3e6   :  { %s1520_s21 = scalar_lea.vmem %s1407_s20, 768  ;;  %p1525_p11 = scmp.lt.s32.totalorder %s1407_s20, %s1407_s20 }
 0x3e7   :  { %p1521_p10 = scmp.ne.s32.totalorder %s1407_s20, %s1520_s21  ;;  %p1526_p12 = scmp.lt.s32.totalorder %s1520_s21, %s1520_s21 }
 0x3e8   :  { %961 = vrot.lane.b32.xlu0 %v812_v58, %s1560_s10 }
 0x3e9   :  { %p1527_p13 = por %p1526_p12, %p1525_p11 }
 0x3eb   :  { %p1528_p0 = pnand %p1527_p13, %p1521_p10 }
 0x3ec   :  { %951 = vrot.lane.b32.xlu0 %v795_v59, %s1560_s10 }
 0x3f0   :  { %1023 = vrot.lane.b32.xlu0 %v904_v62, %s1560_s10 }
 0x3f4   :  { %1001 = vrot.lane.b32.xlu0 %v868_v0, %s1560_s10 }
 0x3f8   :  { %977 = vrot.lane.b32.xlu0 %v832_v11, %s1560_s10 }
 0x3fa   :  { %v2212_v13 = vpop.permute.xlu1 %971 }
 0x3fc   :  { %953 = vrot.lane.b32.xlu0 %v796_v10, %s1560_s10 }
 0x406   :  { %v2214_v15 = vpop.permute.xlu1 %947 }
 0x40a   :  { %v918_v16 = vpop.permute.xlu1 %917 }
 0x40b   :  { %1041 = vrot.lane.b32.xlu1 %v918_v16, %s1560_s10 }
 0x40e   :  { %v900_v17 = vpop.permute.xlu1 %899  ;;  %v2219_v18 = vpop.permute.xlu0 %983 }
 0x40f   :  { %1029 = vrot.lane.b32.xlu0 %v900_v17, %s1560_s10 }
 0x412   :  { %v882_v2 = vpop.permute.xlu1 %881 }
 0x413   :  { %1017 = vrot.lane.b32.xlu1 %v882_v2, %s1560_s10 }
 0x416   :  { %v862_v5 = vpop.permute.xlu1 %861 }
 0x417   :  { %v869_v34 = vsel %vm865_vm10, %v860_v60, %v862_v5 }
 0x41a   :  { %v846_v19 = vpop.permute.xlu1 %845  ;;  %v2221_v20 = vpop.permute.xlu0 %959 }
 0x41e   :  { %v826_v21 = vpop.permute.xlu1 %825  ;;  %v916_v22 = vpop.permute.xlu0 %915 }
 0x41f   :  { %v923_v23 = vsel %vm919_vm12, %v2140_v38, %v916_v22  ;;  %v924_v24 = vsel %vm919_vm12, %v916_v22, %v918_v16  ;;  %v833_v41 = vsel %vm829_vm11, %v824_v9, %v826_v21 }
 0x420   :  { %1039 = vrot.lane.b32.xlu0 %v924_v24, %s1560_s10  ;;  %1037 = vrot.lane.b32.xlu1 %v923_v23, %s1560_s10 }
 0x422   :  { %v810_v25 = vpop.permute.xlu1 %809  ;;  %v898_v26 = vpop.permute.xlu0 %897 }
 0x423   :  { %v905_v46 = vsel %vm901_vm0, %v896_v42, %v898_v26  ;;  %v906_v27 = vsel %vm901_vm0, %v898_v26, %v900_v17 }
 0x424   :  { %1027 = vrot.lane.b32.xlu1 %v906_v27, %s1560_s10  ;;  %1025 = vrot.lane.b32.xlu0 %v905_v46, %s1560_s10 }
 0x426   :  { %v790_v28 = vpop.permute.xlu1 %789  ;;  %v880_v29 = vpop.permute.xlu0 %879 }
 0x427   :  { %v887_v32 = vsel %vm883_vm15, %v878_v49, %v880_v29  ;;  %v888_v31 = vsel %vm883_vm15, %v880_v29, %v882_v2  ;;  %v797_v53 = vsel %vm793_vm14, %v2204_v4, %v790_v28 }
 0x428   :  { %1015 = vrot.lane.b32.xlu0 %v888_v31, %s1560_s10  ;;  %1013 = vrot.lane.b32.xlu1 %v887_v32, %s1560_s10 }
 0x42a   :  { %v1022_v33 = vpop.permute.xlu1 %1021  ;;  %v864_v6 = vpop.permute.xlu0 %863 }
 0x42b   :  { %v870_v45 = vsel %vm865_vm10, %v862_v5, %v864_v6 }
 0x42c   :  { %1003 = vrot.lane.b32.xlu1 %v869_v34, %s1560_s10  ;;  %1005 = vrot.lane.b32.xlu0 %v870_v45, %s1560_s10 }
 0x42e   :  { %v1020_v35 = vpop.permute.xlu1 %1019  ;;  %v844_v36 = vpop.permute.xlu0 %843 }
 0x42f   :  { %v851_v37 = vsel %vm847_vm5, %v2165_v50, %v844_v36  ;;  %v852_v38 = vsel %vm847_vm5, %v844_v36, %v846_v19  ;;  %v1085_v22 = vsel %vm769_vm9, %v1020_v35, %v1022_v33  ;;  %vm1158_vm5 = vcmask 654336  }
 0x430   :  { %993 = vrot.lane.b32.xlu1 %v852_v38, %s1560_s10  ;;  %991 = vrot.lane.b32.xlu0 %v851_v37, %s1560_s10 }
 0x432   :  { %v998_v39 = vpop.permute.xlu1 %997  ;;  %v828_v40 = vpop.permute.xlu0 %827 }
 0x433   :  { %v834_v42 = vsel %vm829_vm11, %v826_v21, %v828_v40  ;;  %v1075_v26 = vsel %vm769_vm9, %v2210_v12, %v998_v39 }
 0x434   :  { %979 = vrot.lane.b32.xlu1 %v833_v41, %s1560_s10  ;;  %981 = vrot.lane.b32.xlu0 %v834_v42, %s1560_s10 }
 0x436   :  { %v2249_v44 = vpop.permute.xlu1 %987  ;;  %v808_v47 = vpop.permute.xlu0 %807 }
 0x437   :  { %v815_v48 = vsel %vm811_vm13, %v2176_v55, %v808_v47  ;;  %v816_v49 = vsel %vm811_vm13, %v808_v47, %v810_v25 }
 0x438   :  { %969 = vrot.lane.b32.xlu1 %v816_v49, %s1560_s10  ;;  %967 = vrot.lane.b32.xlu0 %v815_v48, %s1560_s10 }
 0x43a   :  { %v974_v50 = vpop.permute.xlu1 %973  ;;  %v792_v7 = vpop.permute.xlu0 %791 }
 0x43b   :  { %v798_v54 = vsel %vm793_vm14, %v790_v28, %v792_v7  ;;  %v1065_v29 = vsel %vm769_vm9, %v2212_v13, %v974_v50 }
 0x43c   :  { %955 = vrot.lane.b32.xlu1 %v797_v53, %s1560_s10  ;;  %957 = vrot.lane.b32.xlu0 %v798_v54, %s1560_s10 }
 0x43e   :  { %v2261_v56 = vpop.permute.xlu1 %963  ;;  %v1034_v55 = vpop.permute.xlu0 %1033 }
 0x440   :  { %944 = vperm.xlu1 %1477, %v1479_v57  }
 0x442   :  { %v950_v58 = vpop.permute.xlu1 %949  ;;  %v1032_v59 = vpop.permute.xlu0 %1031 }
 0x443   :  { %v1090_v0 = vsel %vm769_vm9, %v1032_v59, %v1034_v55  ;;  %v1055_v31 = vsel %vm769_vm9, %v2214_v15, %v950_v58 }
 0x446   :  { %v2266_v60 = vpop.permute.xlu1 %1035  ;;  %v1010_v62 = vpop.permute.xlu0 %1009 }
 0x447   :  { %v1091_v9 = vsel %vm769_vm9, %v1034_v55, %v2266_v60 }
 0x448   :  { %1176 = vmatprep.subr.mxu1 %v1091_v9 }
 0x449   :  { %1177 = vmatpush1.msra.mxu1 %v1090_v0 }
 0x44a   :  { %v1008_v11 = vpop.permute.xlu0 %1007  ;;  %v2277_v5 = vpop.permute.xlu1 %1011 }
 0x44b   :  { %v1081_v23 = vsel %vm769_vm9, %v1010_v62, %v2277_v5  ;;  %v1080_v24 = vsel %vm769_vm9, %v1008_v11, %v1010_v62 }
 0x44e   :  { %v2271_v4 = vpop.permute.xlu0 %999  ;;  %v990_v13 = vpop.permute.xlu1 %989 }
 0x44f   :  { %v1076_v25 = vsel %vm769_vm9, %v998_v39, %v2271_v4  ;;  %v1072_v9 = vsel %vm769_vm9, %v2249_v44, %v990_v13 }
 0x452   :  { %v986_v10 = vpop.permute.xlu0 %985  ;;  %v2315_v15 = vpop.permute.xlu1 %965 }
 0x453   :  { %v1071_v46 = vsel %vm769_vm9, %v986_v10, %v2249_v44  ;;  %v1070_v27 = vsel %vm769_vm9, %v2219_v18, %v986_v10 }
 0x456   :  { %v2273_v16 = vpop.permute.xlu0 %975 }
 0x457   :  { %v1066_v28 = vsel %vm769_vm9, %v974_v50, %v2273_v16 }
 0x45a   :  { %v962_v17 = vpop.permute.xlu0 %961 }
 0x45b   :  { %v1061_v12 = vsel %vm769_vm9, %v962_v17, %v2261_v56  ;;  %v1060_v32 = vsel %vm769_vm9, %v2221_v20, %v962_v17  ;;  %v1099_v20 = vsel %vm769_vm9, %v1974_v52, %v1971_v51 }
 0x45e   :  { %v2275_v2 = vpop.permute.xlu0 %951 }
 0x45f   :  { %v1056_v18 = vsel %vm769_vm9, %v950_v58, %v2275_v2 }
 0x462   :  { %v1024_v19 = vpop.permute.xlu0 %1023 }
 0x463   :  { %v1086_v21 = vsel %vm769_vm9, %v1022_v33, %v1024_v19  ;;  %v2304_v33 = vld [vmem:[#allocation5] sm:$0xff] }
 0x464   :  { %1178 = vmatprep.subr.mxu1 %v1086_v21 }
 0x465   :  { %1179 = vmatpush1.msra.mxu1 %v1085_v22  ;;  %v1062_v22 = vsel %vm769_vm9, %v2261_v56, %v2315_v15 }
 0x466   :  { %1180 = vmatprep.subr.mxu1 %v1081_v23  ;;  %v1002_v34 = vpop.permute.xlu0 %1001 }
 0x467   :  { %1181 = vmatpush1.msra.mxu1 %v1080_v24  ;;  %v1077_v57 = vsel %vm769_vm9, %v2271_v4, %v1002_v34 }
 0x468   :  { %1182 = vmatprep.subr.mxu1 %v1076_v25 }
 0x469   :  { %1183 = vmatpush1.msra.mxu1 %v1075_v26 }
 0x46a   :  { %1184 = vmatprep.subr.mxu1 %v1071_v46 }
 0x46b   :  { %1185 = vmatpush1.msra.mxu1 %v1070_v27 }
 0x46c   :  { %1186 = vmatprep.subr.mxu1 %v1066_v28 }
 0x46d   :  { %1187 = vmatpush1.msra.mxu1 %v1065_v29 }
 0x46e   :  { %1188 = vmatprep.subr.mxu1 %v1061_v12 }
 0x46f   :  { %1189 = vmatpush1.msra.mxu1 %v1060_v32 }
 0x470   :  { %1190 = vmatprep.subr.mxu1 %v1056_v18 }
 0x471   :  { %1191 = vmatpush1.msra.mxu1 %v1055_v31 }
 0x472   :  { %1192 = vmatprep.subr.mxu1 %v1989_v63  ;;  %v978_v63 = vpop.permute.xlu0 %977 }
 0x473   :  { %1193 = vmatpush1.msra.mxu1 %v1984_v61  ;;  %v1067_v17 = vsel %vm769_vm9, %v2273_v16, %v978_v63 }
 0x474   :  { %1316 = vmatprep.subr.mxu1 %v1971_v51  ;;  %1425 = vmatmul.mubr.msk.f32.vlgmr.msra.gmra.mxu1 %vm1158_vm5, %v2304_v33 }
 0x475   :  { %1317 = vmatpush1.msra.mxu1 %v1099_v20  ;;  %1368 = vmatprep.mubr.f32.mxu1 %v1556_v3 }
 0x476   :  { %v2317_v45 = vpop.permute.xlu0 %953 }
 0x477   :  { %v1057_v26 = vsel %vm769_vm9, %v2275_v2, %v2317_v45 }
 0x47d   :  { %v1042_v6 = vpop.permute.xlu1 %1041 }
 0x47e   :  { %1318 = vmatprep.subr.mxu1 %v1042_v6 }
 0x481   :  { %v1030_v61 = vpop.permute.xlu0 %1029 }
 0x485   :  { %v1018_v35 = vpop.permute.xlu1 %1017 }
 0x492   :  { %v1038_v36 = vpop.permute.xlu1 %1037  ;;  %v1040_v37 = vpop.permute.xlu0 %1039 }
 0x493   :  { %v1092_v38 = vsel %vm769_vm9, %v2266_v60, %v1038_v36  ;;  %v1094_v51 = vsel %vm769_vm9, %v1040_v37, %v1042_v6  ;;  %v1093_v52 = vsel %vm769_vm9, %v1038_v36, %v1040_v37 }
 0x494   :  { %1247 = vmatprep.subr.mxu0 %v1093_v52  ;;  %1319 = vmatpush1.msra.mxu1 %v1094_v51 }
 0x495   :  { %1248 = vmatpush1.msra.mxu0 %v1092_v38  ;;  %1320 = vmatprep.subr.mxu1 %v1030_v61 }
 0x496   :  { %v1028_v3 = vpop.permute.xlu1 %1027  ;;  %v1026_v39 = vpop.permute.xlu0 %1025 }
 0x497   :  { %v1089_v40 = vsel %vm769_vm9, %v1028_v3, %v1030_v61  ;;  %v1087_v41 = vsel %vm769_vm9, %v1024_v19, %v1026_v39  ;;  %v1088_v42 = vsel %vm769_vm9, %v1026_v39, %v1028_v3 }
 0x498   :  { %1249 = vmatprep.subr.mxu0 %v1088_v42  ;;  %1321 = vmatpush1.msra.mxu1 %v1089_v40 }
 0x499   :  { %1250 = vmatpush1.msra.mxu0 %v1087_v41  ;;  %1322 = vmatprep.subr.mxu1 %v1018_v35 }
 0x49a   :  { %v1014_v43 = vpop.permute.xlu1 %1013  ;;  %v1016_v47 = vpop.permute.xlu0 %1015 }
 0x49b   :  { %v1082_v48 = vsel %vm769_vm9, %v2277_v5, %v1014_v43  ;;  %v1084_v49 = vsel %vm769_vm9, %v1016_v47, %v1018_v35  ;;  %v1083_v50 = vsel %vm769_vm9, %v1014_v43, %v1016_v47 }
 0x49c   :  { %1251 = vmatprep.subr.mxu0 %v1083_v50  ;;  %1323 = vmatpush1.msra.mxu1 %v1084_v49 }
 0x49d   :  { %1252 = vmatpush1.msra.mxu0 %v1082_v48 }
 0x49e   :  { %v1004_v7 = vpop.permute.xlu1 %1003  ;;  %v1006_v53 = vpop.permute.xlu0 %1005 }
 0x49f   :  { %v1079_v54 = vsel %vm769_vm9, %v1004_v7, %v1006_v53  ;;  %1324 = vmatprep.subr.mxu1 %v1006_v53  ;;  %v1078_v55 = vsel %vm769_vm9, %v1002_v34, %v1004_v7 }
 0x4a0   :  { %1253 = vmatprep.subr.mxu0 %v1078_v55  ;;  %1325 = vmatpush1.msra.mxu1 %v1079_v54 }
 0x4a1   :  { %1254 = vmatpush1.msra.mxu0 %v1077_v57 }
 0x4a2   :  { %v994_v58 = vpop.permute.xlu1 %993  ;;  %v992_v59 = vpop.permute.xlu0 %991 }
 0x4a3   :  { %v1074_v60 = vsel %vm769_vm9, %v992_v59, %v994_v58  ;;  %1326 = vmatprep.subr.mxu1 %v994_v58  ;;  %v1073_v62 = vsel %vm769_vm9, %v990_v13, %v992_v59 }
 0x4a4   :  { %1255 = vmatprep.subr.mxu0 %v1073_v62  ;;  %1327 = vmatpush1.msra.mxu1 %v1074_v60 }
 0x4a5   :  { %1256 = vmatpush1.msra.mxu0 %v1072_v9 }
 0x4a6   :  { %v980_v0 = vpop.permute.xlu1 %979  ;;  %v982_v11 = vpop.permute.xlu0 %981 }
 0x4a7   :  { %v1069_v4 = vsel %vm769_vm9, %v980_v0, %v982_v11  ;;  %1328 = vmatprep.subr.mxu1 %v982_v11  ;;  %v1068_v10 = vsel %vm769_vm9, %v978_v63, %v980_v0 }
 0x4a8   :  { %1257 = vmatprep.subr.mxu0 %v1068_v10  ;;  %1329 = vmatpush1.msra.mxu1 %v1069_v4 }
 0x4a9   :  { %1258 = vmatpush1.msra.mxu0 %v1067_v17 }
 0x4aa   :  { %v970_v5 = vpop.permute.xlu1 %969  ;;  %v968_v19 = vpop.permute.xlu0 %967 }
 0x4ab   :  { %v1064_v44 = vsel %vm769_vm9, %v968_v19, %v970_v5  ;;  %1330 = vmatprep.subr.mxu1 %v970_v5  ;;  %v1063_v21 = vsel %vm769_vm9, %v2315_v15, %v968_v19 }
 0x4ac   :  { %1259 = vmatprep.subr.mxu0 %v1063_v21  ;;  %1331 = vmatpush1.msra.mxu1 %v1064_v44 }
 0x4ad   :  { %1260 = vmatpush1.msra.mxu0 %v1062_v22 }
 0x4ae   :  { %v956_v23 = vpop.permute.xlu1 %955  ;;  %v958_v16 = vpop.permute.xlu0 %957 }
 0x4af   :  { %v1059_v24 = vsel %vm769_vm9, %v956_v23, %v958_v16  ;;  %1332 = vmatprep.subr.mxu1 %v958_v16  ;;  %v1058_v25 = vsel %vm769_vm9, %v2317_v45, %v956_v23 }
 0x4b0   :  { %1261 = vmatprep.subr.mxu0 %v1058_v25  ;;  %1333 = vmatpush1.msra.mxu1 %v1059_v24 }
 0x4b1   :  { %1262 = vmatpush1.msra.mxu0 %v1057_v26  ;;  %1334 = vmatprep.subr.mxu1 %v2066_v14 }
 0x4b2   :  { %1263 = vmatprep.subr.mxu0 %v2031_v8  ;;  %1335 = vmatpush1.msra.mxu1 %v2101_v30 }
 0x4b3   :  { %1264 = vmatpush1.msra.mxu0 %v2000_v1  ;;  %1427 = vmatmul.mubr.msk.f32.vlgmr.msra.gmra.mxu1 %vm1158_vm5, %v2304_v33 }
 0x4b4   :  { %1426 = vmatmul.mubr.msk.f32.vlgmr.msra.gmra.mxu0 %vm1158_vm5, %v2304_v33 }
 0x4bb   :  { %v945_v56 = vpop.permute.xlu1 %944 }
 0x534   :  { %v1228_v46 = vpop.f32.mrf.mxu1 }
 0x535   :  { %v1229_v2 = vadd.f32 %v1228_v46, %v945_v56 }
 0x536   :  { %v1230_v27 = vpop.f32.mrf.mxu1 }
 0x537   :  { %vm1375_vm1 = vcmp.gt.f32.partialorder %v1229_v2, 0.0  ;;  %v1381_v28 = vmul.f32 0.1, %v1229_v2  ;;  %v1231_v29 = vadd.f32 %v1230_v27, %v945_v56 }
 0x539   :  { %v1387_v14 = vsel %vm1375_vm1, %v1229_v2, %v1381_v28  ;;  %vm1376_vm2 = vcmp.gt.f32.partialorder %v1231_v29, 0.0  ;;  %v1382_v8 = vmul.f32 0.1, %v1231_v29 }
 0x53a   :  { %1393 = vst [vmem:[#allocation7] sm:$0xff] %v1387_v14 }
 0x53b   :  { %v1388_v30 = vsel %vm1376_vm2, %v1231_v29, %v1382_v8 }
 0x53c   :  { %1394 = vst [vmem:[#allocation7 + $0x8] sm:$0xff] %v1388_v30 }
 0x573   :  { %v1370_v1 = vpop.f32.mrf.mxu1 }
 0x574   :  { %v1371_v12 = vadd.f32 %v1370_v1, %v945_v56  ;;  %v1299_v32 = vpop.f32.mrf.mxu0 }
 0x575   :  { %v1300_v18 = vadd.f32 %v1299_v32, %v945_v56  ;;  %v1372_v31 = vpop.f32.mrf.mxu1 }
 0x576   :  { %vm1379_vm3 = vcmp.gt.f32.partialorder %v1371_v12, 0.0  ;;  %v1385_v33 = vmul.f32 0.1, %v1371_v12  ;;  %v1373_v13 = vadd.f32 %v1372_v31, %v945_v56  ;;  %v1301_v20 = vpop.f32.mrf.mxu0 }
 0x577   :  { %vm1377_vm4 = vcmp.gt.f32.partialorder %v1300_v18, 0.0  ;;  %v1383_v15 = vmul.f32 0.1, %v1300_v18  ;;  %v1302_v6 = vadd.f32 %v1301_v20, %v945_v56 }
 0x578   :  { %v1391_v34 = vsel %vm1379_vm3, %v1371_v12, %v1385_v33  ;;  %vm1380_vm6 = vcmp.gt.f32.partialorder %v1373_v13, 0.0  ;;  %v1386_v63 = vmul.f32 0.1, %v1373_v13 }
 0x579   :  { %1397 = vst [vmem:[#allocation7 + $0x20] sm:$0xff] %v1391_v34  ;;  %v1389_v45 = vsel %vm1377_vm4, %v1300_v18, %v1383_v15  ;;  %vm1378_vm8 = vcmp.gt.f32.partialorder %v1302_v6, 0.0  ;;  %v1384_v61 = vmul.f32 0.1, %v1302_v6 }
 0x57a   :  { %1395 = vst [vmem:[#allocation7 + $0x10] sm:$0xff] %v1389_v45  ;;  %v1392_v35 = vsel %vm1380_vm6, %v1373_v13, %v1386_v63 }
 0x57b   :  { %1399 = vst.msk [vmem:[#allocation7 + $0x28] sm:$0xff] %vm1398_vm7, %v1392_v35  ;;  %v1390_v36 = vsel %vm1378_vm8, %v1302_v6, %v1384_v61 }
 0x57c   :  { %1396 = vst [vmem:[#allocation7 + $0x18] sm:$0xff] %v1390_v36 }
 0x57d   :  { %1531 = shalt.err (!%p1528_p0)
}
 0x57e   :  { %1409 = dma.vmem_to_hbm [thread:$0]  %s1407_s20, 768, %s2369_s4, [#allocation4]  }
 0x57f   :  { %1544 = dma.done.wait [#allocation4], 768  }
 0x580   :  { %1545 = vsyncadd [#allocation4], 4294966528 }
 0x581   :  { %1413 = vsyncpa [#allocation3], 1 }
 0x582   :  { %1414 = vsyncpa [#allocation6], 1 }
 0x583   :  { %1415 = vsyncpa [#allocation4], 1 }

</bundles_post_ra>
